<compile_context>
chip_gen: v7x
topology: tpu7x:2x2x1
jax: 0.10.0
libtpu: 0.0.40
codegen_flags: <defaults>
</compile_context>

<pallas_src>
import jax
import jax.numpy as jnp
from jax.experimental import pallas as pl
from jax.experimental.pallas import tpu as pltpu

# ----- model hyper-parameters (small, BERT-like) ------------------------------
VOCAB = 100
MAX_POS = 30          # matches max_length=30 in the tokenizer call
HIDDEN = 32
FFN = 64
NUM_HEADS = 4
HEAD_DIM = HIDDEN // NUM_HEADS
NUM_LAYERS = 2
LN_EPS = 1e-12        # BERT layer-norm eps

# order in which packed weights are passed to the kernel
WEIGHT_KEYS = ["emb_ln_g", "emb_ln_b",
               "wq", "bq", "wk", "bk", "wv", "bv",
               "wo", "bo", "g1", "b1",
               "wi", "bi", "wp", "bp", "g2", "b2"]


# ----- in-kernel helpers ------------------------------------------------------
def _layernorm(x, g, b):
    mu = jnp.mean(x, axis=-1, keepdims=True)
    var = jnp.mean((x - mu) ** 2, axis=-1, keepdims=True)
    return (x - mu) * jax.lax.rsqrt(var + LN_EPS) * g + b


def _gelu(x):
    # TODO(synk): BERT uses exact erf-GELU; tanh approximation used here.
    return 0.5 * x * (1.0 + jnp.tanh(0.7978845608028654 * (x + 0.044715 * x * x * x)))


# ----- fused Pallas kernel ----------------------------------------------------
def fused_text_kernel(x_ref, bias_ref, eg_ref, eb_ref,
                      wq_ref, bq_ref, wk_ref, bk_ref, wv_ref, bv_ref,
                      wo_ref, bo_ref, g1_ref, b1_ref,
                      wi_ref, bi_ref, wp_ref, bp_ref, g2_ref, b2_ref,
                      o_ref):
    S = x_ref.shape[1]
    # embedding LayerNorm
    x = _layernorm(x_ref[0], eg_ref[...], eb_ref[...])          # (S, H) f32
    bias = bias_ref[0][None, :, :]                               # (1, 1, S) f32
    scale = 1.0 / (HEAD_DIM ** 0.5)

    for l in range(NUM_LAYERS):                                  # static unroll
        xb = x.astype(jnp.bfloat16)
        xh = jnp.broadcast_to(xb[None], (NUM_HEADS, S, HIDDEN))  # (NH, S, H)

        # head-batched Q/K/V projections (weights pre-split per head, bf16)
        q = jnp.einsum('hse,hed->hsd', xh, wq_ref[l],
                       preferred_element_type=jnp.float32) + bq_ref[l]
        k = jnp.einsum('hse,hed->hsd', xh, wk_ref[l],
                       preferred_element_type=jnp.float32) + bk_ref[l]
        v = jnp.einsum('hse,hed->hsd', xh, wv_ref[l],
                       preferred_element_type=jnp.float32) + bv_ref[l]

        # attention scores + masked softmax (f32)
        s = jnp.einsum('hqd,hkd->hqk', q.astype(jnp.bfloat16),
                       k.astype(jnp.bfloat16),
                       preferred_element_type=jnp.float32) * scale + bias
        m = jnp.max(s, axis=-1, keepdims=True)
        p = jnp.exp(s - m)
        p = p * pl.reciprocal(jnp.sum(p, axis=-1, keepdims=True), approx=True)

        # context + output projection (per-head weight slabs, summed over heads)
        ctx = jnp.einsum('hqk,hkd->hqd', p.astype(jnp.bfloat16),
                         v.astype(jnp.bfloat16),
                         preferred_element_type=jnp.float32)     # (NH, S, HD)
        attn = jnp.einsum('hqd,hdf->hqf', ctx.astype(jnp.bfloat16), wo_ref[l],
                          preferred_element_type=jnp.float32)    # (NH, S, H)
        attn = jnp.sum(attn, axis=0) + bo_ref[l]                 # (S, H)

        x1 = _layernorm(x + attn, g1_ref[l], b1_ref[l])

        # feed-forward
        h = jnp.dot(x1.astype(jnp.bfloat16), wi_ref[l],
                    preferred_element_type=jnp.float32) + bi_ref[l]
        h = _gelu(h)
        ffn = jnp.dot(h.astype(jnp.bfloat16), wp_ref[l],
                      preferred_element_type=jnp.float32) + bp_ref[l]
        x = _layernorm(x1 + ffn, g2_ref[l], b2_ref[l])

    # only emit the CLS row (lane-light but S x less writeback than full x)
    o_ref[0] = x[0:1, :]


# ----- pallas_call wrapper ----------------------------------------------------
def text_encoder_fused(x, attn_bias, packed):
    B, S, H = x.shape
    weight_args = [packed[k] for k in WEIGHT_KEYS]

    def full_spec(a):
        n = a.ndim
        return pl.BlockSpec(a.shape, lambda b, _n=n: (0,) * _n)

    w_specs = [full_spec(w) for w in weight_args]

    out = pl.pallas_call(
        fused_text_kernel,
        out_shape=jax.ShapeDtypeStruct((B, 1, H), jnp.float32),
        grid=(B,),
        in_specs=[pl.BlockSpec((1, S, H), lambda b: (b, 0, 0)),
                  pl.BlockSpec((1, 1, S), lambda b: (b, 0, 0))] + w_specs,
        out_specs=pl.BlockSpec((1, 1, H), lambda b: (b, 0, 0)),
        compiler_params=pltpu.CompilerParams(
            dimension_semantics=("parallel",),
            vmem_limit_bytes=16 * 1024 * 1024),
    )(x, attn_bias, *weight_args)
    return out[:, 0, :]                                          # (B, H) CLS


# ----- deterministic parameter init (synthetic BERT weights) ------------------
def init_params(key):
    keys = jax.random.split(key, 3 + NUM_LAYERS)
    std = 0.02
    params = {
        "word_emb": std * jax.random.normal(keys[0], (VOCAB, HIDDEN), jnp.float32),
        "pos_emb": std * jax.random.normal(keys[1], (MAX_POS, HIDDEN), jnp.float32),
        "type_emb": std * jax.random.normal(keys[2], (2, HIDDEN), jnp.float32),
        "emb_ln_g": jnp.ones((1, HIDDEN), jnp.float32),
        "emb_ln_b": jnp.zeros((1, HIDDEN), jnp.float32),
        "layers": [],
    }
    for l in range(NUM_LAYERS):
        ks = jax.random.split(keys[3 + l], 6)
        lp = [
            std * jax.random.normal(ks[0], (HIDDEN, HIDDEN), jnp.float32),  # wq
            jnp.zeros((1, HIDDEN), jnp.float32),                            # bq
            std * jax.random.normal(ks[1], (HIDDEN, HIDDEN), jnp.float32),  # wk
            jnp.zeros((1, HIDDEN), jnp.float32),                            # bk
            std * jax.random.normal(ks[2], (HIDDEN, HIDDEN), jnp.float32),  # wv
            jnp.zeros((1, HIDDEN), jnp.float32),                            # bv
            std * jax.random.normal(ks[3], (HIDDEN, HIDDEN), jnp.float32),  # wo
            jnp.zeros((1, HIDDEN), jnp.float32),                            # bo
            jnp.ones((1, HIDDEN), jnp.float32),                             # ln1 gamma
            jnp.zeros((1, HIDDEN), jnp.float32),                            # ln1 beta
            std * jax.random.normal(ks[4], (HIDDEN, FFN), jnp.float32),     # wi
            jnp.zeros((1, FFN), jnp.float32),                               # bi
            std * jax.random.normal(ks[5], (FFN, HIDDEN), jnp.float32),     # wp
            jnp.zeros((1, HIDDEN), jnp.float32),                            # bp
            jnp.ones((1, HIDDEN), jnp.float32),                             # ln2 gamma
            jnp.zeros((1, HIDDEN), jnp.float32),                            # ln2 beta
        ]
        params["layers"].append(lp)
    return params


def pack_params(params):
    """Stack per-layer weights along a leading L axis, split Q/K/V/O per head,
    cast matmul weight matrices to bf16 (f32 accumulation in the kernel)."""
    L = len(params["layers"])

    def stack(i):
        return jnp.stack([lp[i] for lp in params["layers"]], axis=0)

    wq, bq = stack(0), stack(1)
    wk, bk = stack(2), stack(3)
    wv, bv = stack(4), stack(5)
    wo, bo = stack(6), stack(7)
    g1, b1 = stack(8), stack(9)
    wi, bi = stack(10), stack(11)
    wp, bp = stack(12), stack(13)
    g2, b2 = stack(14), stack(15)

    def heads_in(w, b):
        # (L,H,H)->(L,NH,H,HD); (L,1,H)->(L,NH,1,HD)   (column grouping = heads)
        w_h = w.reshape(L, HIDDEN, NUM_HEADS, HEAD_DIM).transpose(0, 2, 1, 3)
        b_h = b.reshape(L, 1, NUM_HEADS, HEAD_DIM).transpose(0, 2, 1, 3)
        return w_h.astype(jnp.bfloat16), b_h

    wq_h, bq_h = heads_in(wq, bq)
    wk_h, bk_h = heads_in(wk, bk)
    wv_h, bv_h = heads_in(wv, bv)
    wo_h = wo.reshape(L, NUM_HEADS, HEAD_DIM, HIDDEN).astype(jnp.bfloat16)

    return {
        "emb_ln_g": params["emb_ln_g"], "emb_ln_b": params["emb_ln_b"],
        "wq": wq_h, "bq": bq_h, "wk": wk_h, "bk": bk_h, "wv": wv_h, "bv": bv_h,
        "wo": wo_h, "bo": bo, "g1": g1, "b1": b1,
        "wi": wi.astype(jnp.bfloat16), "bi": bi,
        "wp": wp.astype(jnp.bfloat16), "bp": bp,
        "g2": g2, "b2": b2,
    }


# ----- forward pass (mirrors TextModel.forward after tokenization) ------------
def text_model_forward(input_ids, attention_mask, params, packed):
    B, S = input_ids.shape
    # Embedding lookup + position/type embeddings (glue, plain JAX gather).
    we = jnp.take(params["word_emb"], input_ids, axis=0)          # (B, S, H)
    pe = params["pos_emb"][:S][None, :, :]                        # (1, S, H)
    te = params["type_emb"][0][None, None, :]                     # TODO(synk): token_type_ids assumed all 0 (single-sentence captions)
    x = (we + pe + te).astype(jnp.float32)

    # precompute the BERT extended attention bias once, reused by both layers
    attn_bias = ((1.0 - attention_mask.astype(jnp.float32)) * -10000.0)[:, None, :]

    # word_embeddings = outputs.last_hidden_state[:, 0, :]  (CLS token)
    return text_encoder_fused(x, attn_bias, packed)


if __name__ == "__main__":
    key = jax.random.PRNGKey(0)
    pkey, ikey = jax.random.split(key)
    params = init_params(pkey)
    packed = pack_params(params)

    B, S = 2, 8
    input_ids = jax.random.randint(ikey, (B, S), 0, VOCAB, dtype=jnp.int32)
    attention_mask = jnp.array([[1] * S, [1] * (S - 2) + [0] * 2], dtype=jnp.int32)

    cls_emb = jax.jit(text_model_forward)(input_ids, attention_mask, params, packed)
    cls_emb = jax.block_until_ready(cls_emb)
    assert cls_emb.shape == (B, HIDDEN)
    print("KERNEL_OK")
</pallas_src>

<mosaic_0001>
module attributes {stable_mosaic.version = 11 : i64} {
  func.func @fused_text_kernel(%arg0: i32, %arg1: memref<1x8x32xf32, #tpu.memory_space<vmem>>, %arg2: memref<1x1x8xf32, #tpu.memory_space<vmem>>, %arg3: memref<1x32xf32, #tpu.memory_space<vmem>>, %arg4: memref<1x32xf32, #tpu.memory_space<vmem>>, %arg5: memref<2x4x32x8xbf16, #tpu.memory_space<vmem>>, %arg6: memref<2x4x1x8xf32, #tpu.memory_space<vmem>>, %arg7: memref<2x4x32x8xbf16, #tpu.memory_space<vmem>>, %arg8: memref<2x4x1x8xf32, #tpu.memory_space<vmem>>, %arg9: memref<2x4x32x8xbf16, #tpu.memory_space<vmem>>, %arg10: memref<2x4x1x8xf32, #tpu.memory_space<vmem>>, %arg11: memref<2x4x8x32xbf16, #tpu.memory_space<vmem>>, %arg12: memref<2x1x32xf32, #tpu.memory_space<vmem>>, %arg13: memref<2x1x32xf32, #tpu.memory_space<vmem>>, %arg14: memref<2x1x32xf32, #tpu.memory_space<vmem>>, %arg15: memref<2x32x64xbf16, #tpu.memory_space<vmem>>, %arg16: memref<2x1x64xf32, #tpu.memory_space<vmem>>, %arg17: memref<2x64x32xbf16, #tpu.memory_space<vmem>>, %arg18: memref<2x1x32xf32, #tpu.memory_space<vmem>>, %arg19: memref<2x1x32xf32, #tpu.memory_space<vmem>>, %arg20: memref<2x1x32xf32, #tpu.memory_space<vmem>>, %arg21: memref<1x1x32xf32, #tpu.memory_space<vmem>>) attributes {dimension_semantics = [#tpu.dimension_semantics<parallel>], iteration_bounds = array<i64: 2>, scalar_prefetch = 0 : i64, scratch_operands = 0 : i64, tpu.core_type = #tpu.core_type<tc>, window_params = [{transform_indices = @transform_0, window_bounds = array<i64: 1, 8, 32>}, {transform_indices = @transform_1, window_bounds = array<i64: 1, 1, 8>}, {pipeline_mode = #tpu.pipeline_mode<synchronous>, transform_indices = @transform_2, window_bounds = array<i64: 1, 32>}, {pipeline_mode = #tpu.pipeline_mode<synchronous>, transform_indices = @transform_3, window_bounds = array<i64: 1, 32>}, {pipeline_mode = #tpu.pipeline_mode<synchronous>, transform_indices = @transform_4, window_bounds = array<i64: 2, 4, 32, 8>}, {pipeline_mode = #tpu.pipeline_mode<synchronous>, transform_indices = @transform_5, window_bounds = array<i64: 2, 4, 1, 8>}, {pipeline_mode = #tpu.pipeline_mode<synchronous>, transform_indices = @transform_6, window_bounds = array<i64: 2, 4, 32, 8>}, {pipeline_mode = #tpu.pipeline_mode<synchronous>, transform_indices = @transform_7, window_bounds = array<i64: 2, 4, 1, 8>}, {pipeline_mode = #tpu.pipeline_mode<synchronous>, transform_indices = @transform_8, window_bounds = array<i64: 2, 4, 32, 8>}, {pipeline_mode = #tpu.pipeline_mode<synchronous>, transform_indices = @transform_9, window_bounds = array<i64: 2, 4, 1, 8>}, {pipeline_mode = #tpu.pipeline_mode<synchronous>, transform_indices = @transform_10, window_bounds = array<i64: 2, 4, 8, 32>}, {pipeline_mode = #tpu.pipeline_mode<synchronous>, transform_indices = @transform_11, window_bounds = array<i64: 2, 1, 32>}, {pipeline_mode = #tpu.pipeline_mode<synchronous>, transform_indices = @transform_12, window_bounds = array<i64: 2, 1, 32>}, {pipeline_mode = #tpu.pipeline_mode<synchronous>, transform_indices = @transform_13, window_bounds = array<i64: 2, 1, 32>}, {pipeline_mode = #tpu.pipeline_mode<synchronous>, transform_indices = @transform_14, window_bounds = array<i64: 2, 32, 64>}, {pipeline_mode = #tpu.pipeline_mode<synchronous>, transform_indices = @transform_15, window_bounds = array<i64: 2, 1, 64>}, {pipeline_mode = #tpu.pipeline_mode<synchronous>, transform_indices = @transform_16, window_bounds = array<i64: 2, 64, 32>}, {pipeline_mode = #tpu.pipeline_mode<synchronous>, transform_indices = @transform_17, window_bounds = array<i64: 2, 1, 32>}, {pipeline_mode = #tpu.pipeline_mode<synchronous>, transform_indices = @transform_18, window_bounds = array<i64: 2, 1, 32>}, {pipeline_mode = #tpu.pipeline_mode<synchronous>, transform_indices = @transform_19, window_bounds = array<i64: 2, 1, 32>}, {transform_indices = @transform_20, window_bounds = array<i64: 1, 1, 32>}]} {
    %c0 = arith.constant 0 : index
    %c0_0 = arith.constant 0 : index
    %c0_1 = arith.constant 0 : index
    %0 = vector.load %arg1[%c0, %c0_0, %c0_1] : memref<1x8x32xf32, #tpu.memory_space<vmem>>, vector<1x8x32xf32>
    %1 = vector.shape_cast %0 : vector<1x8x32xf32> to vector<8x32xf32>
    %c0_2 = arith.constant 0 : index
    %c0_3 = arith.constant 0 : index
    %2 = vector.load %arg3[%c0_2, %c0_3] : memref<1x32xf32, #tpu.memory_space<vmem>>, vector<1x32xf32>
    %c0_4 = arith.constant 0 : index
    %c0_5 = arith.constant 0 : index
    %3 = vector.load %arg4[%c0_4, %c0_5] : memref<1x32xf32, #tpu.memory_space<vmem>>, vector<1x32xf32>
    %cst = arith.constant dense<0.000000e+00> : vector<8xf32>
    %4 = vector.multi_reduction <add>, %1, %cst [1] : vector<8x32xf32> to vector<8xf32>
    %5 = vector.shape_cast %4 : vector<8xf32> to vector<8x1xf32>
    %cst_6 = arith.constant 3.200000e+01 : f32
    %6 = vector.broadcast %cst_6 : f32 to vector<8x1xf32>
    %7 = arith.divf %5, %6 : vector<8x1xf32>
    %8 = vector.broadcast %7 : vector<8x1xf32> to vector<8x32xf32>
    %9 = arith.subf %1, %8 : vector<8x32xf32>
    %10 = arith.mulf %9, %9 : vector<8x32xf32>
    %cst_7 = arith.constant dense<0.000000e+00> : vector<8xf32>
    %11 = vector.multi_reduction <add>, %10, %cst_7 [1] : vector<8x32xf32> to vector<8xf32>
    %12 = vector.shape_cast %11 : vector<8xf32> to vector<8x1xf32>
    %cst_8 = arith.constant 3.200000e+01 : f32
    %13 = vector.broadcast %cst_8 : f32 to vector<8x1xf32>
    %14 = arith.divf %12, %13 : vector<8x1xf32>
    %15 = vector.broadcast %7 : vector<8x1xf32> to vector<8x32xf32>
    %16 = arith.subf %1, %15 : vector<8x32xf32>
    %cst_9 = arith.constant 9.99999996E-13 : f32
    %17 = vector.broadcast %cst_9 : f32 to vector<8x1xf32>
    %18 = arith.addf %14, %17 : vector<8x1xf32>
    %19 = math.rsqrt %18 : vector<8x1xf32>
    %20 = vector.broadcast %19 : vector<8x1xf32> to vector<8x32xf32>
    %21 = arith.mulf %16, %20 : vector<8x32xf32>
    %22 = vector.broadcast %2 : vector<1x32xf32> to vector<8x32xf32>
    %23 = arith.mulf %21, %22 : vector<8x32xf32>
    %24 = vector.broadcast %3 : vector<1x32xf32> to vector<8x32xf32>
    %25 = arith.addf %23, %24 : vector<8x32xf32>
    %c0_10 = arith.constant 0 : index
    %c0_11 = arith.constant 0 : index
    %c0_12 = arith.constant 0 : index
    %26 = vector.load %arg2[%c0_10, %c0_11, %c0_12] : memref<1x1x8xf32, #tpu.memory_space<vmem>>, vector<1x1x8xf32>
    %27 = vector.shape_cast %26 : vector<1x1x8xf32> to vector<1x8xf32>
    %28 = vector.shape_cast %27 : vector<1x8xf32> to vector<1x1x8xf32>
    %29 = arith.truncf %25 : vector<8x32xf32> to vector<8x32xbf16>
    %30 = vector.shape_cast %29 : vector<8x32xbf16> to vector<1x8x32xbf16>
    %31 = vector.shape_cast %30 : vector<1x8x32xbf16> to vector<1x8x32xbf16>
    %32 = vector.broadcast %31 : vector<1x8x32xbf16> to vector<4x8x32xbf16>
    %c0_13 = arith.constant 0 : index
    %c0_14 = arith.constant 0 : index
    %c0_15 = arith.constant 0 : index
    %c0_16 = arith.constant 0 : index
    %33 = vector.load %arg5[%c0_13, %c0_14, %c0_15, %c0_16] : memref<2x4x32x8xbf16, #tpu.memory_space<vmem>>, vector<1x4x32x8xbf16>
    %34 = vector.shape_cast %33 : vector<1x4x32x8xbf16> to vector<4x32x8xbf16>
    "tpu.trace_start"() <{level = 10 : i32, message = "hse,hed->hsd"}> : () -> ()
    %cst_17 = arith.constant dense<0.000000e+00> : vector<4x8x8xf32>
    %35 = tpu.matmul %32, %34, %cst_17 {dimension_numbers = #tpu.dot_dimension_numbers<[2], [1], [1], [2], [0, 0, 0, 1, 1, 2], [0], [0]>} : vector<4x8x32xbf16>, vector<4x32x8xbf16>, vector<4x8x8xf32> -> vector<4x8x8xf32>
    "tpu.trace_stop"() : () -> ()
    %c0_18 = arith.constant 0 : index
    %c0_19 = arith.constant 0 : index
    %c0_20 = arith.constant 0 : index
    %c0_21 = arith.constant 0 : index
    %36 = vector.load %arg6[%c0_18, %c0_19, %c0_20, %c0_21] : memref<2x4x1x8xf32, #tpu.memory_space<vmem>>, vector<1x4x1x8xf32>
    %37 = vector.shape_cast %36 : vector<1x4x1x8xf32> to vector<4x1x8xf32>
    %38 = vector.broadcast %37 : vector<4x1x8xf32> to vector<4x8x8xf32>
    %39 = arith.addf %35, %38 : vector<4x8x8xf32>
    %c0_22 = arith.constant 0 : index
    %c0_23 = arith.constant 0 : index
    %c0_24 = arith.constant 0 : index
    %c0_25 = arith.constant 0 : index
    %40 = vector.load %arg7[%c0_22, %c0_23, %c0_24, %c0_25] : memref<2x4x32x8xbf16, #tpu.memory_space<vmem>>, vector<1x4x32x8xbf16>
    %41 = vector.shape_cast %40 : vector<1x4x32x8xbf16> to vector<4x32x8xbf16>
    "tpu.trace_start"() <{level = 10 : i32, message = "hse,hed->hsd"}> : () -> ()
    %cst_26 = arith.constant dense<0.000000e+00> : vector<4x8x8xf32>
    %42 = tpu.matmul %32, %41, %cst_26 {dimension_numbers = #tpu.dot_dimension_numbers<[2], [1], [1], [2], [0, 0, 0, 1, 1, 2], [0], [0]>} : vector<4x8x32xbf16>, vector<4x32x8xbf16>, vector<4x8x8xf32> -> vector<4x8x8xf32>
    "tpu.trace_stop"() : () -> ()
    %c0_27 = arith.constant 0 : index
    %c0_28 = arith.constant 0 : index
    %c0_29 = arith.constant 0 : index
    %c0_30 = arith.constant 0 : index
    %43 = vector.load %arg8[%c0_27, %c0_28, %c0_29, %c0_30] : memref<2x4x1x8xf32, #tpu.memory_space<vmem>>, vector<1x4x1x8xf32>
    %44 = vector.shape_cast %43 : vector<1x4x1x8xf32> to vector<4x1x8xf32>
    %45 = vector.broadcast %44 : vector<4x1x8xf32> to vector<4x8x8xf32>
    %46 = arith.addf %42, %45 : vector<4x8x8xf32>
    %c0_31 = arith.constant 0 : index
    %c0_32 = arith.constant 0 : index
    %c0_33 = arith.constant 0 : index
    %c0_34 = arith.constant 0 : index
    %47 = vector.load %arg9[%c0_31, %c0_32, %c0_33, %c0_34] : memref<2x4x32x8xbf16, #tpu.memory_space<vmem>>, vector<1x4x32x8xbf16>
    %48 = vector.shape_cast %47 : vector<1x4x32x8xbf16> to vector<4x32x8xbf16>
    "tpu.trace_start"() <{level = 10 : i32, message = "hse,hed->hsd"}> : () -> ()
    %cst_35 = arith.constant dense<0.000000e+00> : vector<4x8x8xf32>
    %49 = tpu.matmul %32, %48, %cst_35 {dimension_numbers = #tpu.dot_dimension_numbers<[2], [1], [1], [2], [0, 0, 0, 1, 1, 2], [0], [0]>} : vector<4x8x32xbf16>, vector<4x32x8xbf16>, vector<4x8x8xf32> -> vector<4x8x8xf32>
    "tpu.trace_stop"() : () -> ()
    %c0_36 = arith.constant 0 : index
    %c0_37 = arith.constant 0 : index
    %c0_38 = arith.constant 0 : index
    %c0_39 = arith.constant 0 : index
    %50 = vector.load %arg10[%c0_36, %c0_37, %c0_38, %c0_39] : memref<2x4x1x8xf32, #tpu.memory_space<vmem>>, vector<1x4x1x8xf32>
    %51 = vector.shape_cast %50 : vector<1x4x1x8xf32> to vector<4x1x8xf32>
    %52 = vector.broadcast %51 : vector<4x1x8xf32> to vector<4x8x8xf32>
    %53 = arith.addf %49, %52 : vector<4x8x8xf32>
    %54 = arith.truncf %39 : vector<4x8x8xf32> to vector<4x8x8xbf16>
    %55 = arith.truncf %46 : vector<4x8x8xf32> to vector<4x8x8xbf16>
    "tpu.trace_start"() <{level = 10 : i32, message = "hqd,hkd->hqk"}> : () -> ()
    %cst_40 = arith.constant dense<0.000000e+00> : vector<4x8x8xf32>
    %56 = tpu.matmul %54, %55, %cst_40 {dimension_numbers = #tpu.dot_dimension_numbers<[2], [2], [1], [1], [0, 0, 0, 1, 1, 1], [0], [0]>} : vector<4x8x8xbf16>, vector<4x8x8xbf16>, vector<4x8x8xf32> -> vector<4x8x8xf32>
    "tpu.trace_stop"() : () -> ()
    %cst_41 = arith.constant 0.353553385 : f32
    %57 = vector.broadcast %cst_41 : f32 to vector<4x8x8xf32>
    %58 = arith.mulf %56, %57 : vector<4x8x8xf32>
    %59 = vector.broadcast %28 : vector<1x1x8xf32> to vector<4x8x8xf32>
    %60 = arith.addf %58, %59 : vector<4x8x8xf32>
    %cst_42 = arith.constant dense<0xFF800000> : vector<4x8xf32>
    %61 = vector.multi_reduction <maximumf>, %60, %cst_42 [2] : vector<4x8x8xf32> to vector<4x8xf32>
    %62 = vector.shape_cast %61 : vector<4x8xf32> to vector<4x8x1xf32>
    %63 = vector.broadcast %62 : vector<4x8x1xf32> to vector<4x8x8xf32>
    %64 = arith.subf %60, %63 : vector<4x8x8xf32>
    %65 = math.exp %64 : vector<4x8x8xf32>
    %cst_43 = arith.constant dense<0.000000e+00> : vector<4x8xf32>
    %66 = vector.multi_reduction <add>, %65, %cst_43 [2] : vector<4x8x8xf32> to vector<4x8xf32>
    %67 = vector.shape_cast %66 : vector<4x8xf32> to vector<4x8x1xf32>
    %68 = tpu.reciprocal %67 {approx = true} : vector<4x8x1xf32> -> vector<4x8x1xf32>
    %69 = vector.broadcast %68 : vector<4x8x1xf32> to vector<4x8x8xf32>
    %70 = arith.mulf %65, %69 : vector<4x8x8xf32>
    %71 = arith.truncf %70 : vector<4x8x8xf32> to vector<4x8x8xbf16>
    %72 = arith.truncf %53 : vector<4x8x8xf32> to vector<4x8x8xbf16>
    "tpu.trace_start"() <{level = 10 : i32, message = "hqk,hkd->hqd"}> : () -> ()
    %cst_44 = arith.constant dense<0.000000e+00> : vector<4x8x8xf32>
    %73 = tpu.matmul %71, %72, %cst_44 {dimension_numbers = #tpu.dot_dimension_numbers<[2], [1], [1], [2], [0, 0, 0, 1, 1, 2], [0], [0]>} : vector<4x8x8xbf16>, vector<4x8x8xbf16>, vector<4x8x8xf32> -> vector<4x8x8xf32>
    "tpu.trace_stop"() : () -> ()
    %74 = arith.truncf %73 : vector<4x8x8xf32> to vector<4x8x8xbf16>
    %c0_45 = arith.constant 0 : index
    %c0_46 = arith.constant 0 : index
    %c0_47 = arith.constant 0 : index
    %c0_48 = arith.constant 0 : index
    %75 = vector.load %arg11[%c0_45, %c0_46, %c0_47, %c0_48] : memref<2x4x8x32xbf16, #tpu.memory_space<vmem>>, vector<1x4x8x32xbf16>
    %76 = vector.shape_cast %75 : vector<1x4x8x32xbf16> to vector<4x8x32xbf16>
    "tpu.trace_start"() <{level = 10 : i32, message = "hqd,hdf->hqf"}> : () -> ()
    %cst_49 = arith.constant dense<0.000000e+00> : vector<4x8x32xf32>
    %77 = tpu.matmul %74, %76, %cst_49 {dimension_numbers = #tpu.dot_dimension_numbers<[2], [1], [1], [2], [0, 0, 0, 1, 1, 2], [0], [0]>} : vector<4x8x8xbf16>, vector<4x8x32xbf16>, vector<4x8x32xf32> -> vector<4x8x32xf32>
    "tpu.trace_stop"() : () -> ()
    %cst_50 = arith.constant dense<0.000000e+00> : vector<8x32xf32>
    %78 = vector.multi_reduction <add>, %77, %cst_50 [0] : vector<4x8x32xf32> to vector<8x32xf32>
    %c0_51 = arith.constant 0 : index
    %c0_52 = arith.constant 0 : index
    %c0_53 = arith.constant 0 : index
    %79 = vector.load %arg12[%c0_51, %c0_52, %c0_53] : memref<2x1x32xf32, #tpu.memory_space<vmem>>, vector<1x1x32xf32>
    %80 = vector.shape_cast %79 : vector<1x1x32xf32> to vector<1x32xf32>
    %81 = vector.broadcast %80 : vector<1x32xf32> to vector<8x32xf32>
    %82 = arith.addf %78, %81 : vector<8x32xf32>
    %83 = arith.addf %25, %82 : vector<8x32xf32>
    %c0_54 = arith.constant 0 : index
    %c0_55 = arith.constant 0 : index
    %c0_56 = arith.constant 0 : index
    %84 = vector.load %arg13[%c0_54, %c0_55, %c0_56] : memref<2x1x32xf32, #tpu.memory_space<vmem>>, vector<1x1x32xf32>
    %85 = vector.shape_cast %84 : vector<1x1x32xf32> to vector<1x32xf32>
    %c0_57 = arith.constant 0 : index
    %c0_58 = arith.constant 0 : index
    %c0_59 = arith.constant 0 : index
    %86 = vector.load %arg14[%c0_57, %c0_58, %c0_59] : memref<2x1x32xf32, #tpu.memory_space<vmem>>, vector<1x1x32xf32>
    %87 = vector.shape_cast %86 : vector<1x1x32xf32> to vector<1x32xf32>
    %cst_60 = arith.constant dense<0.000000e+00> : vector<8xf32>
    %88 = vector.multi_reduction <add>, %83, %cst_60 [1] : vector<8x32xf32> to vector<8xf32>
    %89 = vector.shape_cast %88 : vector<8xf32> to vector<8x1xf32>
    %cst_61 = arith.constant 3.200000e+01 : f32
    %90 = vector.broadcast %cst_61 : f32 to vector<8x1xf32>
    %91 = arith.divf %89, %90 : vector<8x1xf32>
    %92 = vector.broadcast %91 : vector<8x1xf32> to vector<8x32xf32>
    %93 = arith.subf %83, %92 : vector<8x32xf32>
    %94 = arith.mulf %93, %93 : vector<8x32xf32>
    %cst_62 = arith.constant dense<0.000000e+00> : vector<8xf32>
    %95 = vector.multi_reduction <add>, %94, %cst_62 [1] : vector<8x32xf32> to vector<8xf32>
    %96 = vector.shape_cast %95 : vector<8xf32> to vector<8x1xf32>
    %cst_63 = arith.constant 3.200000e+01 : f32
    %97 = vector.broadcast %cst_63 : f32 to vector<8x1xf32>
    %98 = arith.divf %96, %97 : vector<8x1xf32>
    %99 = vector.broadcast %91 : vector<8x1xf32> to vector<8x32xf32>
    %100 = arith.subf %83, %99 : vector<8x32xf32>
    %cst_64 = arith.constant 9.99999996E-13 : f32
    %101 = vector.broadcast %cst_64 : f32 to vector<8x1xf32>
    %102 = arith.addf %98, %101 : vector<8x1xf32>
    %103 = math.rsqrt %102 : vector<8x1xf32>
    %104 = vector.broadcast %103 : vector<8x1xf32> to vector<8x32xf32>
    %105 = arith.mulf %100, %104 : vector<8x32xf32>
    %106 = vector.broadcast %85 : vector<1x32xf32> to vector<8x32xf32>
    %107 = arith.mulf %105, %106 : vector<8x32xf32>
    %108 = vector.broadcast %87 : vector<1x32xf32> to vector<8x32xf32>
    %109 = arith.addf %107, %108 : vector<8x32xf32>
    %110 = arith.truncf %109 : vector<8x32xf32> to vector<8x32xbf16>
    %c0_65 = arith.constant 0 : index
    %c0_66 = arith.constant 0 : index
    %c0_67 = arith.constant 0 : index
    %111 = vector.load %arg15[%c0_65, %c0_66, %c0_67] : memref<2x32x64xbf16, #tpu.memory_space<vmem>>, vector<1x32x64xbf16>
    %112 = vector.shape_cast %111 : vector<1x32x64xbf16> to vector<32x64xbf16>
    %cst_68 = arith.constant dense<0.000000e+00> : vector<8x64xf32>
    %113 = tpu.matmul %110, %112, %cst_68 {dimension_numbers = #tpu.dot_dimension_numbers<[1], [0], [0], [1], [0, 0, 1, 1], [], []>} : vector<8x32xbf16>, vector<32x64xbf16>, vector<8x64xf32> -> vector<8x64xf32>
    %c0_69 = arith.constant 0 : index
    %c0_70 = arith.constant 0 : index
    %c0_71 = arith.constant 0 : index
    %114 = vector.load %arg16[%c0_69, %c0_70, %c0_71] : memref<2x1x64xf32, #tpu.memory_space<vmem>>, vector<1x1x64xf32>
    %115 = vector.shape_cast %114 : vector<1x1x64xf32> to vector<1x64xf32>
    %116 = vector.broadcast %115 : vector<1x64xf32> to vector<8x64xf32>
    %117 = arith.addf %113, %116 : vector<8x64xf32>
    %cst_72 = arith.constant 5.000000e-01 : f32
    %118 = vector.broadcast %cst_72 : f32 to vector<8x64xf32>
    %119 = arith.mulf %118, %117 : vector<8x64xf32>
    %cst_73 = arith.constant 4.471500e-02 : f32
    %120 = vector.broadcast %cst_73 : f32 to vector<8x64xf32>
    %121 = arith.mulf %120, %117 : vector<8x64xf32>
    %122 = arith.mulf %121, %117 : vector<8x64xf32>
    %123 = arith.mulf %122, %117 : vector<8x64xf32>
    %124 = arith.addf %117, %123 : vector<8x64xf32>
    %cst_74 = arith.constant 0.797884583 : f32
    %125 = vector.broadcast %cst_74 : f32 to vector<8x64xf32>
    %126 = arith.mulf %125, %124 : vector<8x64xf32>
    %127 = math.tanh %126 : vector<8x64xf32>
    %cst_75 = arith.constant 1.000000e+00 : f32
    %128 = vector.broadcast %cst_75 : f32 to vector<8x64xf32>
    %129 = arith.addf %128, %127 : vector<8x64xf32>
    %130 = arith.mulf %119, %129 : vector<8x64xf32>
    %131 = arith.truncf %130 : vector<8x64xf32> to vector<8x64xbf16>
    %c0_76 = arith.constant 0 : index
    %c0_77 = arith.constant 0 : index
    %c0_78 = arith.constant 0 : index
    %132 = vector.load %arg17[%c0_76, %c0_77, %c0_78] : memref<2x64x32xbf16, #tpu.memory_space<vmem>>, vector<1x64x32xbf16>
    %133 = vector.shape_cast %132 : vector<1x64x32xbf16> to vector<64x32xbf16>
    %cst_79 = arith.constant dense<0.000000e+00> : vector<8x32xf32>
    %134 = tpu.matmul %131, %133, %cst_79 {dimension_numbers = #tpu.dot_dimension_numbers<[1], [0], [0], [1], [0, 0, 1, 1], [], []>} : vector<8x64xbf16>, vector<64x32xbf16>, vector<8x32xf32> -> vector<8x32xf32>
    %c0_80 = arith.constant 0 : index
    %c0_81 = arith.constant 0 : index
    %c0_82 = arith.constant 0 : index
    %135 = vector.load %arg18[%c0_80, %c0_81, %c0_82] : memref<2x1x32xf32, #tpu.memory_space<vmem>>, vector<1x1x32xf32>
    %136 = vector.shape_cast %135 : vector<1x1x32xf32> to vector<1x32xf32>
    %137 = vector.broadcast %136 : vector<1x32xf32> to vector<8x32xf32>
    %138 = arith.addf %134, %137 : vector<8x32xf32>
    %139 = arith.addf %109, %138 : vector<8x32xf32>
    %c0_83 = arith.constant 0 : index
    %c0_84 = arith.constant 0 : index
    %c0_85 = arith.constant 0 : index
    %140 = vector.load %arg19[%c0_83, %c0_84, %c0_85] : memref<2x1x32xf32, #tpu.memory_space<vmem>>, vector<1x1x32xf32>
    %141 = vector.shape_cast %140 : vector<1x1x32xf32> to vector<1x32xf32>
    %c0_86 = arith.constant 0 : index
    %c0_87 = arith.constant 0 : index
    %c0_88 = arith.constant 0 : index
    %142 = vector.load %arg20[%c0_86, %c0_87, %c0_88] : memref<2x1x32xf32, #tpu.memory_space<vmem>>, vector<1x1x32xf32>
    %143 = vector.shape_cast %142 : vector<1x1x32xf32> to vector<1x32xf32>
    %cst_89 = arith.constant dense<0.000000e+00> : vector<8xf32>
    %144 = vector.multi_reduction <add>, %139, %cst_89 [1] : vector<8x32xf32> to vector<8xf32>
    %145 = vector.shape_cast %144 : vector<8xf32> to vector<8x1xf32>
    %cst_90 = arith.constant 3.200000e+01 : f32
    %146 = vector.broadcast %cst_90 : f32 to vector<8x1xf32>
    %147 = arith.divf %145, %146 : vector<8x1xf32>
    %148 = vector.broadcast %147 : vector<8x1xf32> to vector<8x32xf32>
    %149 = arith.subf %139, %148 : vector<8x32xf32>
    %150 = arith.mulf %149, %149 : vector<8x32xf32>
    %cst_91 = arith.constant dense<0.000000e+00> : vector<8xf32>
    %151 = vector.multi_reduction <add>, %150, %cst_91 [1] : vector<8x32xf32> to vector<8xf32>
    %152 = vector.shape_cast %151 : vector<8xf32> to vector<8x1xf32>
    %cst_92 = arith.constant 3.200000e+01 : f32
    %153 = vector.broadcast %cst_92 : f32 to vector<8x1xf32>
    %154 = arith.divf %152, %153 : vector<8x1xf32>
    %155 = vector.broadcast %147 : vector<8x1xf32> to vector<8x32xf32>
    %156 = arith.subf %139, %155 : vector<8x32xf32>
    %cst_93 = arith.constant 9.99999996E-13 : f32
    %157 = vector.broadcast %cst_93 : f32 to vector<8x1xf32>
    %158 = arith.addf %154, %157 : vector<8x1xf32>
    %159 = math.rsqrt %158 : vector<8x1xf32>
    %160 = vector.broadcast %159 : vector<8x1xf32> to vector<8x32xf32>
    %161 = arith.mulf %156, %160 : vector<8x32xf32>
    %162 = vector.broadcast %141 : vector<1x32xf32> to vector<8x32xf32>
    %163 = arith.mulf %161, %162 : vector<8x32xf32>
    %164 = vector.broadcast %143 : vector<1x32xf32> to vector<8x32xf32>
    %165 = arith.addf %163, %164 : vector<8x32xf32>
    %166 = arith.truncf %165 : vector<8x32xf32> to vector<8x32xbf16>
    %167 = vector.shape_cast %166 : vector<8x32xbf16> to vector<1x8x32xbf16>
    %168 = vector.shape_cast %167 : vector<1x8x32xbf16> to vector<1x8x32xbf16>
    %169 = vector.broadcast %168 : vector<1x8x32xbf16> to vector<4x8x32xbf16>
    %c1 = arith.constant 1 : index
    %c0_94 = arith.constant 0 : index
    %c0_95 = arith.constant 0 : index
    %c0_96 = arith.constant 0 : index
    %170 = vector.load %arg5[%c1, %c0_94, %c0_95, %c0_96] : memref<2x4x32x8xbf16, #tpu.memory_space<vmem>>, vector<1x4x32x8xbf16>
    %171 = vector.shape_cast %170 : vector<1x4x32x8xbf16> to vector<4x32x8xbf16>
    "tpu.trace_start"() <{level = 10 : i32, message = "hse,hed->hsd"}> : () -> ()
    %cst_97 = arith.constant dense<0.000000e+00> : vector<4x8x8xf32>
    %172 = tpu.matmul %169, %171, %cst_97 {dimension_numbers = #tpu.dot_dimension_numbers<[2], [1], [1], [2], [0, 0, 0, 1, 1, 2], [0], [0]>} : vector<4x8x32xbf16>, vector<4x32x8xbf16>, vector<4x8x8xf32> -> vector<4x8x8xf32>
    "tpu.trace_stop"() : () -> ()
    %c1_98 = arith.constant 1 : index
    %c0_99 = arith.constant 0 : index
    %c0_100 = arith.constant 0 : index
    %c0_101 = arith.constant 0 : index
    %173 = vector.load %arg6[%c1_98, %c0_99, %c0_100, %c0_101] : memref<2x4x1x8xf32, #tpu.memory_space<vmem>>, vector<1x4x1x8xf32>
    %174 = vector.shape_cast %173 : vector<1x4x1x8xf32> to vector<4x1x8xf32>
    %175 = vector.broadcast %174 : vector<4x1x8xf32> to vector<4x8x8xf32>
    %176 = arith.addf %172, %175 : vector<4x8x8xf32>
    %c1_102 = arith.constant 1 : index
    %c0_103 = arith.constant 0 : index
    %c0_104 = arith.constant 0 : index
    %c0_105 = arith.constant 0 : index
    %177 = vector.load %arg7[%c1_102, %c0_103, %c0_104, %c0_105] : memref<2x4x32x8xbf16, #tpu.memory_space<vmem>>, vector<1x4x32x8xbf16>
    %178 = vector.shape_cast %177 : vector<1x4x32x8xbf16> to vector<4x32x8xbf16>
    "tpu.trace_start"() <{level = 10 : i32, message = "hse,hed->hsd"}> : () -> ()
    %cst_106 = arith.constant dense<0.000000e+00> : vector<4x8x8xf32>
    %179 = tpu.matmul %169, %178, %cst_106 {dimension_numbers = #tpu.dot_dimension_numbers<[2], [1], [1], [2], [0, 0, 0, 1, 1, 2], [0], [0]>} : vector<4x8x32xbf16>, vector<4x32x8xbf16>, vector<4x8x8xf32> -> vector<4x8x8xf32>
    "tpu.trace_stop"() : () -> ()
    %c1_107 = arith.constant 1 : index
    %c0_108 = arith.constant 0 : index
    %c0_109 = arith.constant 0 : index
    %c0_110 = arith.constant 0 : index
    %180 = vector.load %arg8[%c1_107, %c0_108, %c0_109, %c0_110] : memref<2x4x1x8xf32, #tpu.memory_space<vmem>>, vector<1x4x1x8xf32>
    %181 = vector.shape_cast %180 : vector<1x4x1x8xf32> to vector<4x1x8xf32>
    %182 = vector.broadcast %181 : vector<4x1x8xf32> to vector<4x8x8xf32>
    %183 = arith.addf %179, %182 : vector<4x8x8xf32>
    %c1_111 = arith.constant 1 : index
    %c0_112 = arith.constant 0 : index
    %c0_113 = arith.constant 0 : index
    %c0_114 = arith.constant 0 : index
    %184 = vector.load %arg9[%c1_111, %c0_112, %c0_113, %c0_114] : memref<2x4x32x8xbf16, #tpu.memory_space<vmem>>, vector<1x4x32x8xbf16>
    %185 = vector.shape_cast %184 : vector<1x4x32x8xbf16> to vector<4x32x8xbf16>
    "tpu.trace_start"() <{level = 10 : i32, message = "hse,hed->hsd"}> : () -> ()
    %cst_115 = arith.constant dense<0.000000e+00> : vector<4x8x8xf32>
    %186 = tpu.matmul %169, %185, %cst_115 {dimension_numbers = #tpu.dot_dimension_numbers<[2], [1], [1], [2], [0, 0, 0, 1, 1, 2], [0], [0]>} : vector<4x8x32xbf16>, vector<4x32x8xbf16>, vector<4x8x8xf32> -> vector<4x8x8xf32>
    "tpu.trace_stop"() : () -> ()
    %c1_116 = arith.constant 1 : index
    %c0_117 = arith.constant 0 : index
    %c0_118 = arith.constant 0 : index
    %c0_119 = arith.constant 0 : index
    %187 = vector.load %arg10[%c1_116, %c0_117, %c0_118, %c0_119] : memref<2x4x1x8xf32, #tpu.memory_space<vmem>>, vector<1x4x1x8xf32>
    %188 = vector.shape_cast %187 : vector<1x4x1x8xf32> to vector<4x1x8xf32>
    %189 = vector.broadcast %188 : vector<4x1x8xf32> to vector<4x8x8xf32>
    %190 = arith.addf %186, %189 : vector<4x8x8xf32>
    %191 = arith.truncf %176 : vector<4x8x8xf32> to vector<4x8x8xbf16>
    %192 = arith.truncf %183 : vector<4x8x8xf32> to vector<4x8x8xbf16>
    "tpu.trace_start"() <{level = 10 : i32, message = "hqd,hkd->hqk"}> : () -> ()
    %cst_120 = arith.constant dense<0.000000e+00> : vector<4x8x8xf32>
    %193 = tpu.matmul %191, %192, %cst_120 {dimension_numbers = #tpu.dot_dimension_numbers<[2], [2], [1], [1], [0, 0, 0, 1, 1, 1], [0], [0]>} : vector<4x8x8xbf16>, vector<4x8x8xbf16>, vector<4x8x8xf32> -> vector<4x8x8xf32>
    "tpu.trace_stop"() : () -> ()
    %cst_121 = arith.constant 0.353553385 : f32
    %194 = vector.broadcast %cst_121 : f32 to vector<4x8x8xf32>
    %195 = arith.mulf %193, %194 : vector<4x8x8xf32>
    %196 = vector.broadcast %28 : vector<1x1x8xf32> to vector<4x8x8xf32>
    %197 = arith.addf %195, %196 : vector<4x8x8xf32>
    %cst_122 = arith.constant dense<0xFF800000> : vector<4x8xf32>
    %198 = vector.multi_reduction <maximumf>, %197, %cst_122 [2] : vector<4x8x8xf32> to vector<4x8xf32>
    %199 = vector.shape_cast %198 : vector<4x8xf32> to vector<4x8x1xf32>
    %200 = vector.broadcast %199 : vector<4x8x1xf32> to vector<4x8x8xf32>
    %201 = arith.subf %197, %200 : vector<4x8x8xf32>
    %202 = math.exp %201 : vector<4x8x8xf32>
    %cst_123 = arith.constant dense<0.000000e+00> : vector<4x8xf32>
    %203 = vector.multi_reduction <add>, %202, %cst_123 [2] : vector<4x8x8xf32> to vector<4x8xf32>
    %204 = vector.shape_cast %203 : vector<4x8xf32> to vector<4x8x1xf32>
    %205 = tpu.reciprocal %204 {approx = true} : vector<4x8x1xf32> -> vector<4x8x1xf32>
    %206 = vector.broadcast %205 : vector<4x8x1xf32> to vector<4x8x8xf32>
    %207 = arith.mulf %202, %206 : vector<4x8x8xf32>
    %208 = arith.truncf %207 : vector<4x8x8xf32> to vector<4x8x8xbf16>
    %209 = arith.truncf %190 : vector<4x8x8xf32> to vector<4x8x8xbf16>
    "tpu.trace_start"() <{level = 10 : i32, message = "hqk,hkd->hqd"}> : () -> ()
    %cst_124 = arith.constant dense<0.000000e+00> : vector<4x8x8xf32>
    %210 = tpu.matmul %208, %209, %cst_124 {dimension_numbers = #tpu.dot_dimension_numbers<[2], [1], [1], [2], [0, 0, 0, 1, 1, 2], [0], [0]>} : vector<4x8x8xbf16>, vector<4x8x8xbf16>, vector<4x8x8xf32> -> vector<4x8x8xf32>
    "tpu.trace_stop"() : () -> ()
    %211 = arith.truncf %210 : vector<4x8x8xf32> to vector<4x8x8xbf16>
    %c1_125 = arith.constant 1 : index
    %c0_126 = arith.constant 0 : index
    %c0_127 = arith.constant 0 : index
    %c0_128 = arith.constant 0 : index
    %212 = vector.load %arg11[%c1_125, %c0_126, %c0_127, %c0_128] : memref<2x4x8x32xbf16, #tpu.memory_space<vmem>>, vector<1x4x8x32xbf16>
    %213 = vector.shape_cast %212 : vector<1x4x8x32xbf16> to vector<4x8x32xbf16>
    "tpu.trace_start"() <{level = 10 : i32, message = "hqd,hdf->hqf"}> : () -> ()
    %cst_129 = arith.constant dense<0.000000e+00> : vector<4x8x32xf32>
    %214 = tpu.matmul %211, %213, %cst_129 {dimension_numbers = #tpu.dot_dimension_numbers<[2], [1], [1], [2], [0, 0, 0, 1, 1, 2], [0], [0]>} : vector<4x8x8xbf16>, vector<4x8x32xbf16>, vector<4x8x32xf32> -> vector<4x8x32xf32>
    "tpu.trace_stop"() : () -> ()
    %cst_130 = arith.constant dense<0.000000e+00> : vector<8x32xf32>
    %215 = vector.multi_reduction <add>, %214, %cst_130 [0] : vector<4x8x32xf32> to vector<8x32xf32>
    %c1_131 = arith.constant 1 : index
    %c0_132 = arith.constant 0 : index
    %c0_133 = arith.constant 0 : index
    %216 = vector.load %arg12[%c1_131, %c0_132, %c0_133] : memref<2x1x32xf32, #tpu.memory_space<vmem>>, vector<1x1x32xf32>
    %217 = vector.shape_cast %216 : vector<1x1x32xf32> to vector<1x32xf32>
    %218 = vector.broadcast %217 : vector<1x32xf32> to vector<8x32xf32>
    %219 = arith.addf %215, %218 : vector<8x32xf32>
    %220 = arith.addf %165, %219 : vector<8x32xf32>
    %c1_134 = arith.constant 1 : index
    %c0_135 = arith.constant 0 : index
    %c0_136 = arith.constant 0 : index
    %221 = vector.load %arg13[%c1_134, %c0_135, %c0_136] : memref<2x1x32xf32, #tpu.memory_space<vmem>>, vector<1x1x32xf32>
    %222 = vector.shape_cast %221 : vector<1x1x32xf32> to vector<1x32xf32>
    %c1_137 = arith.constant 1 : index
    %c0_138 = arith.constant 0 : index
    %c0_139 = arith.constant 0 : index
    %223 = vector.load %arg14[%c1_137, %c0_138, %c0_139] : memref<2x1x32xf32, #tpu.memory_space<vmem>>, vector<1x1x32xf32>
    %224 = vector.shape_cast %223 : vector<1x1x32xf32> to vector<1x32xf32>
    %cst_140 = arith.constant dense<0.000000e+00> : vector<8xf32>
    %225 = vector.multi_reduction <add>, %220, %cst_140 [1] : vector<8x32xf32> to vector<8xf32>
    %226 = vector.shape_cast %225 : vector<8xf32> to vector<8x1xf32>
    %cst_141 = arith.constant 3.200000e+01 : f32
    %227 = vector.broadcast %cst_141 : f32 to vector<8x1xf32>
    %228 = arith.divf %226, %227 : vector<8x1xf32>
    %229 = vector.broadcast %228 : vector<8x1xf32> to vector<8x32xf32>
    %230 = arith.subf %220, %229 : vector<8x32xf32>
    %231 = arith.mulf %230, %230 : vector<8x32xf32>
    %cst_142 = arith.constant dense<0.000000e+00> : vector<8xf32>
    %232 = vector.multi_reduction <add>, %231, %cst_142 [1] : vector<8x32xf32> to vector<8xf32>
    %233 = vector.shape_cast %232 : vector<8xf32> to vector<8x1xf32>
    %cst_143 = arith.constant 3.200000e+01 : f32
    %234 = vector.broadcast %cst_143 : f32 to vector<8x1xf32>
    %235 = arith.divf %233, %234 : vector<8x1xf32>
    %236 = vector.broadcast %228 : vector<8x1xf32> to vector<8x32xf32>
    %237 = arith.subf %220, %236 : vector<8x32xf32>
    %cst_144 = arith.constant 9.99999996E-13 : f32
    %238 = vector.broadcast %cst_144 : f32 to vector<8x1xf32>
    %239 = arith.addf %235, %238 : vector<8x1xf32>
    %240 = math.rsqrt %239 : vector<8x1xf32>
    %241 = vector.broadcast %240 : vector<8x1xf32> to vector<8x32xf32>
    %242 = arith.mulf %237, %241 : vector<8x32xf32>
    %243 = vector.broadcast %222 : vector<1x32xf32> to vector<8x32xf32>
    %244 = arith.mulf %242, %243 : vector<8x32xf32>
    %245 = vector.broadcast %224 : vector<1x32xf32> to vector<8x32xf32>
    %246 = arith.addf %244, %245 : vector<8x32xf32>
    %247 = arith.truncf %246 : vector<8x32xf32> to vector<8x32xbf16>
    %c1_145 = arith.constant 1 : index
    %c0_146 = arith.constant 0 : index
    %c0_147 = arith.constant 0 : index
    %248 = vector.load %arg15[%c1_145, %c0_146, %c0_147] : memref<2x32x64xbf16, #tpu.memory_space<vmem>>, vector<1x32x64xbf16>
    %249 = vector.shape_cast %248 : vector<1x32x64xbf16> to vector<32x64xbf16>
    %cst_148 = arith.constant dense<0.000000e+00> : vector<8x64xf32>
    %250 = tpu.matmul %247, %249, %cst_148 {dimension_numbers = #tpu.dot_dimension_numbers<[1], [0], [0], [1], [0, 0, 1, 1], [], []>} : vector<8x32xbf16>, vector<32x64xbf16>, vector<8x64xf32> -> vector<8x64xf32>
    %c1_149 = arith.constant 1 : index
    %c0_150 = arith.constant 0 : index
    %c0_151 = arith.constant 0 : index
    %251 = vector.load %arg16[%c1_149, %c0_150, %c0_151] : memref<2x1x64xf32, #tpu.memory_space<vmem>>, vector<1x1x64xf32>
    %252 = vector.shape_cast %251 : vector<1x1x64xf32> to vector<1x64xf32>
    %253 = vector.broadcast %252 : vector<1x64xf32> to vector<8x64xf32>
    %254 = arith.addf %250, %253 : vector<8x64xf32>
    %cst_152 = arith.constant 5.000000e-01 : f32
    %255 = vector.broadcast %cst_152 : f32 to vector<8x64xf32>
    %256 = arith.mulf %255, %254 : vector<8x64xf32>
    %cst_153 = arith.constant 4.471500e-02 : f32
    %257 = vector.broadcast %cst_153 : f32 to vector<8x64xf32>
    %258 = arith.mulf %257, %254 : vector<8x64xf32>
    %259 = arith.mulf %258, %254 : vector<8x64xf32>
    %260 = arith.mulf %259, %254 : vector<8x64xf32>
    %261 = arith.addf %254, %260 : vector<8x64xf32>
    %cst_154 = arith.constant 0.797884583 : f32
    %262 = vector.broadcast %cst_154 : f32 to vector<8x64xf32>
    %263 = arith.mulf %262, %261 : vector<8x64xf32>
    %264 = math.tanh %263 : vector<8x64xf32>
    %cst_155 = arith.constant 1.000000e+00 : f32
    %265 = vector.broadcast %cst_155 : f32 to vector<8x64xf32>
    %266 = arith.addf %265, %264 : vector<8x64xf32>
    %267 = arith.mulf %256, %266 : vector<8x64xf32>
    %268 = arith.truncf %267 : vector<8x64xf32> to vector<8x64xbf16>
    %c1_156 = arith.constant 1 : index
    %c0_157 = arith.constant 0 : index
    %c0_158 = arith.constant 0 : index
    %269 = vector.load %arg17[%c1_156, %c0_157, %c0_158] : memref<2x64x32xbf16, #tpu.memory_space<vmem>>, vector<1x64x32xbf16>
    %270 = vector.shape_cast %269 : vector<1x64x32xbf16> to vector<64x32xbf16>
    %cst_159 = arith.constant dense<0.000000e+00> : vector<8x32xf32>
    %271 = tpu.matmul %268, %270, %cst_159 {dimension_numbers = #tpu.dot_dimension_numbers<[1], [0], [0], [1], [0, 0, 1, 1], [], []>} : vector<8x64xbf16>, vector<64x32xbf16>, vector<8x32xf32> -> vector<8x32xf32>
    %c1_160 = arith.constant 1 : index
    %c0_161 = arith.constant 0 : index
    %c0_162 = arith.constant 0 : index
    %272 = vector.load %arg18[%c1_160, %c0_161, %c0_162] : memref<2x1x32xf32, #tpu.memory_space<vmem>>, vector<1x1x32xf32>
    %273 = vector.shape_cast %272 : vector<1x1x32xf32> to vector<1x32xf32>
    %274 = vector.broadcast %273 : vector<1x32xf32> to vector<8x32xf32>
    %275 = arith.addf %271, %274 : vector<8x32xf32>
    %276 = arith.addf %246, %275 : vector<8x32xf32>
    %c1_163 = arith.constant 1 : index
    %c0_164 = arith.constant 0 : index
    %c0_165 = arith.constant 0 : index
    %277 = vector.load %arg19[%c1_163, %c0_164, %c0_165] : memref<2x1x32xf32, #tpu.memory_space<vmem>>, vector<1x1x32xf32>
    %278 = vector.shape_cast %277 : vector<1x1x32xf32> to vector<1x32xf32>
    %c1_166 = arith.constant 1 : index
    %c0_167 = arith.constant 0 : index
    %c0_168 = arith.constant 0 : index
    %279 = vector.load %arg20[%c1_166, %c0_167, %c0_168] : memref<2x1x32xf32, #tpu.memory_space<vmem>>, vector<1x1x32xf32>
    %280 = vector.shape_cast %279 : vector<1x1x32xf32> to vector<1x32xf32>
    %cst_169 = arith.constant dense<0.000000e+00> : vector<8xf32>
    %281 = vector.multi_reduction <add>, %276, %cst_169 [1] : vector<8x32xf32> to vector<8xf32>
    %282 = vector.shape_cast %281 : vector<8xf32> to vector<8x1xf32>
    %cst_170 = arith.constant 3.200000e+01 : f32
    %283 = vector.broadcast %cst_170 : f32 to vector<8x1xf32>
    %284 = arith.divf %282, %283 : vector<8x1xf32>
    %285 = vector.broadcast %284 : vector<8x1xf32> to vector<8x32xf32>
    %286 = arith.subf %276, %285 : vector<8x32xf32>
    %287 = arith.mulf %286, %286 : vector<8x32xf32>
    %cst_171 = arith.constant dense<0.000000e+00> : vector<8xf32>
    %288 = vector.multi_reduction <add>, %287, %cst_171 [1] : vector<8x32xf32> to vector<8xf32>
    %289 = vector.shape_cast %288 : vector<8xf32> to vector<8x1xf32>
    %cst_172 = arith.constant 3.200000e+01 : f32
    %290 = vector.broadcast %cst_172 : f32 to vector<8x1xf32>
    %291 = arith.divf %289, %290 : vector<8x1xf32>
    %292 = vector.broadcast %284 : vector<8x1xf32> to vector<8x32xf32>
    %293 = arith.subf %276, %292 : vector<8x32xf32>
    %cst_173 = arith.constant 9.99999996E-13 : f32
    %294 = vector.broadcast %cst_173 : f32 to vector<8x1xf32>
    %295 = arith.addf %291, %294 : vector<8x1xf32>
    %296 = math.rsqrt %295 : vector<8x1xf32>
    %297 = vector.broadcast %296 : vector<8x1xf32> to vector<8x32xf32>
    %298 = arith.mulf %293, %297 : vector<8x32xf32>
    %299 = vector.broadcast %278 : vector<1x32xf32> to vector<8x32xf32>
    %300 = arith.mulf %298, %299 : vector<8x32xf32>
    %301 = vector.broadcast %280 : vector<1x32xf32> to vector<8x32xf32>
    %302 = arith.addf %300, %301 : vector<8x32xf32>
    %303 = vector.extract_strided_slice %302 {offsets = [0, 0], sizes = [1, 32], strides = [1, 1]} : vector<8x32xf32> to vector<1x32xf32>
    %c0_174 = arith.constant 0 : index
    %c0_175 = arith.constant 0 : index
    %c0_176 = arith.constant 0 : index
    %304 = vector.load %arg21[%c0_174, %c0_175, %c0_176] : memref<1x1x32xf32, #tpu.memory_space<vmem>>, vector<1x1x32xf32>
    %305 = vector.shape_cast %304 : vector<1x1x32xf32> to vector<1x32xf32>
    %306 = vector.shape_cast %303 : vector<1x32xf32> to vector<1x1x32xf32>
    tpu.vector_store %arg21[%c0_174, %c0_175, %c0_176], %306 {strides = array<i32>} : memref<1x1x32xf32, #tpu.memory_space<vmem>>, vector<1x1x32xf32>,
    return
  }
  func.func @transform_0(%arg0: i32) -> (i32, i32, i32) {
    %c0_i32 = arith.constant 0 : i32
    %c0_i32_0 = arith.constant 0 : i32
    %c0_i32_1 = arith.constant 0 : i32
    return %arg0, %c0_i32, %c0_i32_0 : i32, i32, i32
  }
  func.func @transform_1(%arg0: i32) -> (i32, i32, i32) {
    %c0_i32 = arith.constant 0 : i32
    %c0_i32_0 = arith.constant 0 : i32
    %c0_i32_1 = arith.constant 0 : i32
    return %arg0, %c0_i32, %c0_i32_0 : i32, i32, i32
  }
  func.func @transform_2(%arg0: i32) -> (i32, i32) {
    %c0_i32 = arith.constant 0 : i32
    %c0_i32_0 = arith.constant 0 : i32
    %c0_i32_1 = arith.constant 0 : i32
    return %c0_i32, %c0_i32_0 : i32, i32
  }
  func.func @transform_3(%arg0: i32) -> (i32, i32) {
    %c0_i32 = arith.constant 0 : i32
    %c0_i32_0 = arith.constant 0 : i32
    %c0_i32_1 = arith.constant 0 : i32
    return %c0_i32, %c0_i32_0 : i32, i32
  }
  func.func @transform_4(%arg0: i32) -> (i32, i32, i32, i32) {
    %c0_i32 = arith.constant 0 : i32
    %c0_i32_0 = arith.constant 0 : i32
    %c0_i32_1 = arith.constant 0 : i32
    %c0_i32_2 = arith.constant 0 : i32
    %c0_i32_3 = arith.constant 0 : i32
    return %c0_i32, %c0_i32_0, %c0_i32_1, %c0_i32_2 : i32, i32, i32, i32
  }
  func.func @transform_5(%arg0: i32) -> (i32, i32, i32, i32) {
    %c0_i32 = arith.constant 0 : i32
    %c0_i32_0 = arith.constant 0 : i32
    %c0_i32_1 = arith.constant 0 : i32
    %c0_i32_2 = arith.constant 0 : i32
    %c0_i32_3 = arith.constant 0 : i32
    return %c0_i32, %c0_i32_0, %c0_i32_1, %c0_i32_2 : i32, i32, i32, i32
  }
  func.func @transform_6(%arg0: i32) -> (i32, i32, i32, i32) {
    %c0_i32 = arith.constant 0 : i32
    %c0_i32_0 = arith.constant 0 : i32
    %c0_i32_1 = arith.constant 0 : i32
    %c0_i32_2 = arith.constant 0 : i32
    %c0_i32_3 = arith.constant 0 : i32
    return %c0_i32, %c0_i32_0, %c0_i32_1, %c0_i32_2 : i32, i32, i32, i32
  }
  func.func @transform_7(%arg0: i32) -> (i32, i32, i32, i32) {
    %c0_i32 = arith.constant 0 : i32
    %c0_i32_0 = arith.constant 0 : i32
    %c0_i32_1 = arith.constant 0 : i32
    %c0_i32_2 = arith.constant 0 : i32
    %c0_i32_3 = arith.constant 0 : i32
    return %c0_i32, %c0_i32_0, %c0_i32_1, %c0_i32_2 : i32, i32, i32, i32
  }
  func.func @transform_8(%arg0: i32) -> (i32, i32, i32, i32) {
    %c0_i32 = arith.constant 0 : i32
    %c0_i32_0 = arith.constant 0 : i32
    %c0_i32_1 = arith.constant 0 : i32
    %c0_i32_2 = arith.constant 0 : i32
    %c0_i32_3 = arith.constant 0 : i32
    return %c0_i32, %c0_i32_0, %c0_i32_1, %c0_i32_2 : i32, i32, i32, i32
  }
  func.func @transform_9(%arg0: i32) -> (i32, i32, i32, i32) {
    %c0_i32 = arith.constant 0 : i32
    %c0_i32_0 = arith.constant 0 : i32
    %c0_i32_1 = arith.constant 0 : i32
    %c0_i32_2 = arith.constant 0 : i32
    %c0_i32_3 = arith.constant 0 : i32
    return %c0_i32, %c0_i32_0, %c0_i32_1, %c0_i32_2 : i32, i32, i32, i32
  }
  func.func @transform_10(%arg0: i32) -> (i32, i32, i32, i32) {
    %c0_i32 = arith.constant 0 : i32
    %c0_i32_0 = arith.constant 0 : i32
    %c0_i32_1 = arith.constant 0 : i32
    %c0_i32_2 = arith.constant 0 : i32
    %c0_i32_3 = arith.constant 0 : i32
    return %c0_i32, %c0_i32_0, %c0_i32_1, %c0_i32_2 : i32, i32, i32, i32
  }
  func.func @transform_11(%arg0: i32) -> (i32, i32, i32) {
    %c0_i32 = arith.constant 0 : i32
    %c0_i32_0 = arith.constant 0 : i32
    %c0_i32_1 = arith.constant 0 : i32
    %c0_i32_2 = arith.constant 0 : i32
    return %c0_i32, %c0_i32_0, %c0_i32_1 : i32, i32, i32
  }
  func.func @transform_12(%arg0: i32) -> (i32, i32, i32) {
    %c0_i32 = arith.constant 0 : i32
    %c0_i32_0 = arith.constant 0 : i32
    %c0_i32_1 = arith.constant 0 : i32
    %c0_i32_2 = arith.constant 0 : i32
    return %c0_i32, %c0_i32_0, %c0_i32_1 : i32, i32, i32
  }
  func.func @transform_13(%arg0: i32) -> (i32, i32, i32) {
    %c0_i32 = arith.constant 0 : i32
    %c0_i32_0 = arith.constant 0 : i32
    %c0_i32_1 = arith.constant 0 : i32
    %c0_i32_2 = arith.constant 0 : i32
    return %c0_i32, %c0_i32_0, %c0_i32_1 : i32, i32, i32
  }
  func.func @transform_14(%arg0: i32) -> (i32, i32, i32) {
    %c0_i32 = arith.constant 0 : i32
    %c0_i32_0 = arith.constant 0 : i32
    %c0_i32_1 = arith.constant 0 : i32
    %c0_i32_2 = arith.constant 0 : i32
    return %c0_i32, %c0_i32_0, %c0_i32_1 : i32, i32, i32
  }
  func.func @transform_15(%arg0: i32) -> (i32, i32, i32) {
    %c0_i32 = arith.constant 0 : i32
    %c0_i32_0 = arith.constant 0 : i32
    %c0_i32_1 = arith.constant 0 : i32
    %c0_i32_2 = arith.constant 0 : i32
    return %c0_i32, %c0_i32_0, %c0_i32_1 : i32, i32, i32
  }
  func.func @transform_16(%arg0: i32) -> (i32, i32, i32) {
    %c0_i32 = arith.constant 0 : i32
    %c0_i32_0 = arith.constant 0 : i32
    %c0_i32_1 = arith.constant 0 : i32
    %c0_i32_2 = arith.constant 0 : i32
    return %c0_i32, %c0_i32_0, %c0_i32_1 : i32, i32, i32
  }
  func.func @transform_17(%arg0: i32) -> (i32, i32, i32) {
    %c0_i32 = arith.constant 0 : i32
    %c0_i32_0 = arith.constant 0 : i32
    %c0_i32_1 = arith.constant 0 : i32
    %c0_i32_2 = arith.constant 0 : i32
    return %c0_i32, %c0_i32_0, %c0_i32_1 : i32, i32, i32
  }
  func.func @transform_18(%arg0: i32) -> (i32, i32, i32) {
    %c0_i32 = arith.constant 0 : i32
    %c0_i32_0 = arith.constant 0 : i32
    %c0_i32_1 = arith.constant 0 : i32
    %c0_i32_2 = arith.constant 0 : i32
    return %c0_i32, %c0_i32_0, %c0_i32_1 : i32, i32, i32
  }
  func.func @transform_19(%arg0: i32) -> (i32, i32, i32) {
    %c0_i32 = arith.constant 0 : i32
    %c0_i32_0 = arith.constant 0 : i32
    %c0_i32_1 = arith.constant 0 : i32
    %c0_i32_2 = arith.constant 0 : i32
    return %c0_i32, %c0_i32_0, %c0_i32_1 : i32, i32, i32
  }
  func.func @transform_20(%arg0: i32) -> (i32, i32, i32) {
    %c0_i32 = arith.constant 0 : i32
    %c0_i32_0 = arith.constant 0 : i32
    %c0_i32_1 = arith.constant 0 : i32
    return %arg0, %c0_i32, %c0_i32_0 : i32, i32, i32
  }
}

</mosaic_0001>

<bundles_post_ra>
// kernel: text_model_forward.1
= control target key start
LH: loop header
LB: loop body
LE: loop exit
PB: predicated region body
PF: predicated region fallthrough
CT: control target
= control target key end

     0   :  { %s5884_s0 = inlined_call_operand.vmem [shape: f32[2,8,32], index: 0, kind: input, shape index: {}]   ;;  %s5885_s1 = inlined_call_operand.vmem [shape: f32[2,1,8], index: 1, kind: input, shape index: {}]   ;;  %s5886_s2 = inlined_call_operand.vmem [shape: f32[1,32], index: 2, kind: input, shape index: {}]   ;;  %s5887_s3 = inlined_call_operand.vmem [shape: f32[1,32], index: 3, kind: input, shape index: {}]   ;;  %s5888_s4 = inlined_call_operand.vmem [shape: bf16[2,4,32,8], index: 4, kind: input, shape index: {}]   ;;  %s5889_s5 = inlined_call_operand.vmem [shape: f32[2,4,1,8], index: 5, kind: input, shape index: {}]   ;;  %s5890_s6 = inlined_call_operand.vmem [shape: bf16[2,4,32,8], index: 6, kind: input, shape index: {}]   ;;  %s5891_s7 = inlined_call_operand.vmem [shape: f32[2,4,1,8], index: 7, kind: input, shape index: {}]   ;;  %s5892_s8 = inlined_call_operand.vmem [shape: bf16[2,4,32,8], index: 8, kind: input, shape index: {}]   ;;  %s5893_s9 = inlined_call_operand.vmem [shape: f32[2,4,1,8], index: 9, kind: input, shape index: {}]   ;;  %s5894_s10 = inlined_call_operand.vmem [shape: bf16[2,4,8,32], index: 10, kind: input, shape index: {}]   ;;  %s5895_s11 = inlined_call_operand.vmem [shape: f32[2,1,32], index: 11, kind: input, shape index: {}]   ;;  %s5896_s12 = inlined_call_operand.vmem [shape: f32[2,1,32], index: 12, kind: input, shape index: {}]   ;;  %s5897_s13 = inlined_call_operand.vmem [shape: f32[2,1,32], index: 13, kind: input, shape index: {}]   ;;  %s5898_s14 = inlined_call_operand.vmem [shape: bf16[2,32,64], index: 14, kind: input, shape index: {}]   ;;  %s5899_s15 = inlined_call_operand.vmem [shape: f32[2,1,64], index: 15, kind: input, shape index: {}]   ;;  %s5900_s16 = inlined_call_operand.vmem [shape: bf16[2,64,32], index: 16, kind: input, shape index: {}]   ;;  %s5901_s17 = inlined_call_operand.vmem [shape: f32[2,1,32], index: 17, kind: input, shape index: {}]   ;;  %s5902_s18 = inlined_call_operand.vmem [shape: f32[2,1,32], index: 18, kind: input, shape index: {}]   ;;  %s5903_s19 = inlined_call_operand.vmem [shape: f32[2,1,32], index: 19, kind: input, shape index: {}]   ;;  %s5904_s20 = inlined_call_operand.hbm [shape: f32[2,1,32], index: 20, kind: output, shape index: {}]  }
   0x1   :  { %5912 = sst [smem:[#allocation11_spill]] %s5884_s0 }
   0x2   :  { %5913 = sst [smem:[#allocation12_spill]] %s5885_s1 }
   0x3   :  { %5914 = sst [smem:[#allocation13_spill]] %s5886_s2 }
   0x4   :  { %5915 = sst [smem:[#allocation14_spill]] %s5887_s3 }
   0x5   :  { %5916 = sst [smem:[#allocation15_spill]] %s5888_s4 }
   0x6   :  { %25 = vsyncpa [#allocation3], 0 }
   0x7   :  { %27 = vsyncpa [#allocation3 + $0x1], 0  ;;  %s5095_s1 = smov 0   ;;  %s5097_s22 = smov 0  }
   0x8   :  { %s5099_s23 = smov 0   ;;  %s5101_s24 = smov 0  }
   0x9 LB: > { %5917 = sst [smem:[#allocation5_spill]] %s4973_s1  ;;  %s5116_s2 = sadd.s32 4294967295, %s4985_s24   ;;  %s4985_s24 = sphi %s5101_s24, %s5933_s24   ;;  %s4981_s23 = sphi %s5099_s23, %s5935_s23   ;;  %s4977_s22 = sphi %s5097_s22, %s5937_s22   ;;  %s4973_s1 = sphi %s5095_s1, %s5936_s1  }
   0xa   : > { %5918 = sst [smem:[#allocation6_spill]] %s4981_s23  ;;  %s4020_s25 = sadd.s32 4294967294, %s4985_s24  }
   0xb   : > { %5919 = sst [smem:[#allocation7_spill]] %s4985_s24  ;;  %s5120_s3 = sadd.s32 1, %s4985_s24  }
   0xc   : > { %5920 = sst [smem:[#allocation8_spill]] %s5120_s3  ;;  %s470_s26 = sadd.s32 1, %s4981_s23 }
   0xd   : > { %s467_s27 = ssub.s32 %s4985_s24, %s5120_s3  ;;  %p480_p0 = scmp.ne.s32.totalorder %s4981_s23, %s4977_s22 }
   0xe   : > { %p468_p1 = scmp.eq.s32.totalorder %s467_s27, 0  ;;  %p481_p2 = scmp.eq.s32.totalorder %s5116_s2, 1 }
   0xf   : > { %p486_p3 = scmp.ne.s32.totalorder %s4977_s22, %s4973_s1  ;;  %p487_p4 = scmp.eq.s32.totalorder %s4020_s25, 1 }
  0x10   : > { %s5131_s28 = scalar_select %p468_p1, %s4981_s23, %s470_s26  }
  0x11   : > { %p5133_p5 = por %p481_p2, %p480_p0  ;;  %p5137_p6 = por %p487_p4, %p486_p3 }
  0x12   : > { %5921 = sst [smem:[#allocation9_spill]] %s5131_s28  ;;  %p4023_p7 = scmp.ge.s32.totalorder %s4985_s24, 1 }
  0x13   : > { %s5923_s29 = scalar_select %p5137_p6, 1, 0 }
  0x14   : > { %p572_p8 = scmp.lt.s32.totalorder %s4985_s24, 3 }
  0x15   : > { %5924 = sst [smem:[#allocation10_spill]] %s5923_s29 }
  0x16   : > { %p573_p9 = pnand %p4023_p7, %p572_p8 }
  0x17   : > { %p631_p10 = scmp.lt.s32.totalorder (!%p573_p9), %s5116_s2, 1  ;;  %vm642_vm0 = vcmask (!%p573_p9), 261120   ;;  %s5925_s26 = sld [smem:[#allocation11_spill]] (!%p573_p9)  ;;  %v4987_v9 = vmov (!%p573_p9), 0.0   ;;  %vm4988_vm1 = vmmov (!%p573_p9), 0   ;;  %v4822_v22 = vld [vmem:[%s5890_s6] sm:$0xff] (!%p573_p9)  }
  0x18   : > { %576 = sbr.rel (%p573_p9) target bundleno = 4979 (0x1373), region = 100  ;;  %s5926_s3 = sld [smem:[#allocation15_spill]] (!%p573_p9)  ;;  %4400 = vmatprep.subr.bf16.mxu1 (!%p573_p9), %v4987_v9  ;;  %4416 = vmatprep.subr.bf16.mxu0 (!%p573_p9), %v4987_v9  ;;  %v4824_v25 = vld [vmem:[%s5890_s6 + $0x8] sm:$0xff] (!%p573_p9)   ;;  %v4826_v27 = vld [vmem:[%s5890_s6 + $0x20] sm:$0xff] (!%p573_p9)   ;;  %v4829_v30 = vld [vmem:[%s5890_s6 + $0x10] sm:$0xff] (!%p573_p9)   ;;  %vm1440_vm2 = vcmask (!%p573_p9), 64512  }
  0x19   : > { %4404 = vmatprep.mubr.msk.bf16.mxu1 (!%p573_p9), %vm4988_vm1, %v4987_v9  ;;  %4420 = vmatprep.mubr.msk.bf16.mxu0 (!%p573_p9), %vm4988_vm1, %v4987_v9  ;;  %s5927_s25 = sld [smem:[#allocation13_spill]] (!%p573_p9)  ;;  %v4828_v29 = vld [vmem:[%s5890_s6 + $0x28] sm:$0xff] (!%p573_p9)   ;;  %v4830_v31 = vld [vmem:[%s5892_s8] sm:$0xff] (!%p573_p9)   ;;  %v4831_v32 = vld [vmem:[%s5890_s6 + $0x18] sm:$0xff] (!%p573_p9)   ;;  %vm1694_vm3 = vcmask (!%p573_p9), 1043456   ;;  %s5929_s23 = sld [smem:[#allocation12_spill]] (!%p573_p9) }
  0x1a   : > { %v4832_v33 = vld [vmem:[%s5892_s8 + $0x8] sm:$0xff] (!%p573_p9)   ;;  %v4833_v34 = vld [vmem:[%s5890_s6 + $0x30] sm:$0xff] (!%p573_p9)   ;;  %v4834_v35 = vld [vmem:[%s5892_s8 + $0x20] sm:$0xff] (!%p573_p9)   ;;  %vm2229_vm4 = vcmask (!%p573_p9), 523264   ;;  %s629_s21 = sand.u32 (!%p573_p9), 1, %s4977_s22   ;;  %s4261_s29 = sshll.u32 (!%p573_p9), %s5116_s2, 4 }
  0x1b   : > { %v4835_v36 = vld [vmem:[%s5890_s6 + $0x38] sm:$0xff] (!%p573_p9)   ;;  %v4836_v37 = vld [vmem:[%s5892_s8 + $0x28] sm:$0xff] (!%p573_p9)   ;;  %v4837_v38 = vld [vmem:[%s5892_s8 + $0x10] sm:$0xff] (!%p573_p9)   ;;  %vm3941_vm5 = vcmask (!%p573_p9), 253952  }
  0x1c   : > { %v4838_v39 = vld [vmem:[%s5892_s8 + $0x18] sm:$0xff] (!%p573_p9)   ;;  %v4839_v40 = vld [vmem:[%s5892_s8 + $0x30] sm:$0xff] (!%p573_p9)   ;;  %v4043_v50 = vld [vmem:[%s5891_s7] ss:$0 sm:$0xff] (!%p573_p9) }
  0x1d   : > { %v4840_v41 = vld [vmem:[%s5892_s8 + $0x38] sm:$0xff] (!%p573_p9)   ;;  %v4027_v61 = vld [vmem:[%s5889_s5] ss:$0 sm:$0xff] (!%p573_p9)  ;;  %v4045_v63 = vld [vmem:[%s5891_s7 + $0x2] ss:$0 sm:$0xff] (!%p573_p9) }
  0x1e   : > { %v4817_v7 = vld [vmem:[%s5926_s3] sm:$0xff] (!%p573_p9)   ;;  %v4819_v10 = vld [vmem:[%s5926_s3 + $0x8] sm:$0xff] (!%p573_p9)   ;;  %v4821_v21 = vld [vmem:[%s5926_s3 + $0x10] sm:$0xff] (!%p573_p9)  }
  0x1f   : > { %s5145_s30 = scalar_select %p631_p10, %s5116_s2, 1  ;;  %v4818_v8 = vld [vmem:[%s5926_s3 + $0x20] sm:$0xff]   ;;  %4401 = vmatpush3.bf16.msra.mxu1 %v4817_v7  ;;  %v4820_v11 = vld [vmem:[%s5926_s3 + $0x28] sm:$0xff]   ;;  %v4823_v24 = vld [vmem:[%s5926_s3 + $0x18] sm:$0xff]  }
  0x20   : > { %4417 = vmatpush3.bf16.msra.mxu0 %v4818_v8  ;;  %4402 = vmatprep.subr.bf16.mxu1 %v4987_v9  ;;  %v4025_v16 = vld [vmem:[%s5927_s25] ss:$0 sm:$0xff]  ;;  %v4825_v26 = vld [vmem:[%s5926_s3 + $0x30] sm:$0xff]   ;;  %v4827_v28 = vld [vmem:[%s5926_s3 + $0x38] sm:$0xff]   ;;  %s630_s25 = scalar_lea.vmem [#allocation2], %s629_s21  ;;  %s4989_s2 = smov [#allocation2]  }
  0x21   : > { %s4024_s0 = sshll.u32 %s5145_s30, 3  ;;  %4418 = vmatprep.subr.bf16.mxu0 %v4987_v9  ;;  %s637_s28 = scalar_lea.vmem %s5929_s23, %s5145_s30 }
  0x22   : > { %s634_s27 = scalar_lea.vmem %s5925_s26, %s4024_s0  ;;  %s5928_s0 = sld [smem:[#allocation14_spill]] }
  0x23   : > { %v639_v0 = vld [vmem:[%s634_s27] sm:$0xff]  ;;  %4403 = vmatpush3.bf16.msra.mxu1 %v4819_v10  ;;  %s3956_s26 = sshll.u32 %s630_s25, 4  ;;  %s3944_s23 = scalar_lea.sflag [#allocation3], %s629_s21  ;;  %s5844_s26 = int_to_ptr.vmem [resolvable:$true] %s3956_s26 }
  0x24   : > { %v643_v1 = vsel %vm642_vm0, %v639_v0, 0.0  ;;  %4419 = vmatpush3.bf16.msra.mxu0 %v4820_v11  ;;  %4408 = vmatprep.subr.bf16.mxu1 %v4987_v9  ;;  %s4927_s30 = sshll.u32 %s4989_s2, 4  ;;  %s4928_s30 = int_to_ptr.vmem [resolvable:$false] %s4927_s30 }
  0x25   : > { %644 = vadd.xlane.f32.xlu0 %v643_v1  ;;  %4432 = vmatprep.subr.bf16.mxu0 %v4987_v9  ;;  %s4929_s1 = scalar_lea.vmem %s4928_s30, 32  ;;  %p4930_p0 = scmp.lt.s32.totalorder %s5844_s26, %s4928_s30 }
  0x28   : > { %v4026_v18 = vld [vmem:[%s5928_s0] ss:$0 sm:$0xff]  ;;  %s5842_s0 = scalar_lea.hbm %s5904_s20, %s4261_s29 }
  0xb2   : > { %v645_v2 = vpop.xlane.xlu0 %644 }
  0xb3   : > { %v647_v3 = vmul.f32 0.03125, %v645_v2 }
  0xb5   : > { %v648_v4 = vsub.f32 %v639_v0, %v647_v3 }
  0xb7   : > { %v649_v5 = vmul.f32 %v648_v4, %v648_v4 }
  0xb9   : > { %v650_v6 = vsel %vm642_vm0, %v649_v5, 0.0 }
  0xba   : > { %651 = vadd.xlane.f32.xlu0 %v650_v6 }
 0x147   : > { %v652_v12 = vpop.xlane.xlu0 %651 }
 0x148   : > { %v653_v13 = vmul.f32 0.03125, %v652_v12 }
 0x14a   : > { %v654_v14 = vadd.f32 1e-12, %v653_v13  ;;  %v4029_v13 = vld [vmem:[%s5889_s5 + $0x2] ss:$0 sm:$0xff] }
 0x14c   : > { %4877 = vrsqrt.f32 %v654_v14 }
 0x156   : > { %v4878_v15 = vpop.eup %4877 }
 0x157   : > { %v656_v17 = vmul.f32 %v4878_v15, %v648_v4  ;;  %v4044_v15 = vld [vmem:[%s5891_s7 + $0x1] ss:$0 sm:$0xff] }
 0x159   : > { %v663_v19 = vmul.f32 %v4025_v16, %v656_v17  ;;  %v4059_v16 = vld [vmem:[%s5893_s9] ss:$0 sm:$0xff] }
 0x15b   : > { %v5181_v20 = vadd.f32 %v4026_v18, %v663_v19 }
 0x15d   : > { %v5191_v23 = vpack.c.bf16 %v5181_v20, %v5181_v20 }
 0x15f   : > { %4405 = vmatmul.mubr.msk.bf16.vlgmr.msra.gmra.mrb[0].mxu1 %vm642_vm0, %v5191_v23  ;;  %4421 = vmatmul.mubr.msk.bf16.vlgmr.msra.gmra.mrb[0].mxu0 %vm642_vm0, %v5191_v23 }
 0x160   : > { %4409 = vmatpush3.bf16.msra.mxu1 %v4821_v21  ;;  %4433 = vmatpush3.bf16.msra.mxu0 %v4822_v22 }
 0x161   : > { %4410 = vmatprep.subr.bf16.mxu1 %v4987_v9  ;;  %4434 = vmatprep.subr.bf16.mxu0 %v4987_v9 }
 0x162   : > { %4412 = vmatprep.mubr.msk.bf16.mxu1 %vm4988_vm1, %v4987_v9  ;;  %4436 = vmatprep.mubr.msk.bf16.mxu0 %vm4988_vm1, %v4987_v9 }
 0x164   : > { %4411 = vmatpush3.bf16.msra.mxu1 %v4823_v24  ;;  %4435 = vmatpush3.bf16.msra.mxu0 %v4824_v25 }
 0x165   : > { %4424 = vmatprep.subr.bf16.mxu1 %v4987_v9  ;;  %4448 = vmatprep.subr.bf16.mxu0 %v4987_v9 }
 0x167   : > { %4413 = vmatmul.mubr.msk.bf16.vlgmr.msra.gmra.mrb[4].mxu1 %vm642_vm0, %v5191_v23  ;;  %4437 = vmatmul.mubr.msk.bf16.vlgmr.msra.gmra.mrb[4].mxu0 %vm642_vm0, %v5191_v23 }
 0x168   : > { %4425 = vmatpush3.bf16.msra.mxu1 %v4825_v26  ;;  %4449 = vmatpush3.bf16.msra.mxu0 %v4826_v27 }
 0x169   : > { %4426 = vmatprep.subr.bf16.mxu1 %v4987_v9  ;;  %4450 = vmatprep.subr.bf16.mxu0 %v4987_v9 }
 0x16a   : > { %4428 = vmatprep.mubr.msk.bf16.mxu1 %vm4988_vm1, %v4987_v9  ;;  %4452 = vmatprep.mubr.msk.bf16.mxu0 %vm4988_vm1, %v4987_v9 }
 0x16c   : > { %4427 = vmatpush3.bf16.msra.mxu1 %v4827_v28  ;;  %4451 = vmatpush3.bf16.msra.mxu0 %v4828_v29 }
 0x16d   : > { %4440 = vmatprep.subr.bf16.mxu1 %v4987_v9  ;;  %4464 = vmatprep.subr.bf16.mxu0 %v4987_v9 }
 0x16f   : > { %4429 = vmatmul.mubr.msk.bf16.vlgmr.msra.gmra.mrb[8].mxu1 %vm642_vm0, %v5191_v23  ;;  %4453 = vmatmul.mubr.msk.bf16.vlgmr.msra.gmra.mrb[8].mxu0 %vm642_vm0, %v5191_v23 }
 0x170   : > { %4441 = vmatpush3.bf16.msra.mxu1 %v4829_v30  ;;  %4465 = vmatpush3.bf16.msra.mxu0 %v4830_v31 }
 0x171   : > { %4442 = vmatprep.subr.bf16.mxu1 %v4987_v9  ;;  %4466 = vmatprep.subr.bf16.mxu0 %v4987_v9 }
 0x172   : > { %4444 = vmatprep.mubr.msk.bf16.mxu1 %vm4988_vm1, %v4987_v9  ;;  %4468 = vmatprep.mubr.msk.bf16.mxu0 %vm4988_vm1, %v4987_v9 }
 0x174   : > { %4443 = vmatpush3.bf16.msra.mxu1 %v4831_v32  ;;  %4467 = vmatpush3.bf16.msra.mxu0 %v4832_v33  ;;  %v4028_v32 = vld [vmem:[%s5889_s5 + $0x1] ss:$0 sm:$0xff] }
 0x175   : > { %4456 = vmatprep.subr.bf16.mxu1 %v4987_v9  ;;  %4480 = vmatprep.subr.bf16.mxu0 %v4987_v9 }
 0x177   : > { %4445 = vmatmul.mubr.msk.bf16.vlgmr.msra.gmra.mrb[12].mxu1 %vm642_vm0, %v5191_v23  ;;  %4469 = vmatmul.mubr.msk.bf16.vlgmr.msra.gmra.mrb[12].mxu0 %vm642_vm0, %v5191_v23 }
 0x178   : > { %4457 = vmatpush3.bf16.msra.mxu1 %v4833_v34  ;;  %4481 = vmatpush3.bf16.msra.mxu0 %v4834_v35  ;;  %v4046_v35 = vld [vmem:[%s5891_s7 + $0x3] ss:$0 sm:$0xff] }
 0x179   : > { %4458 = vmatprep.subr.bf16.mxu1 %v4987_v9  ;;  %4482 = vmatprep.subr.bf16.mxu0 %v4987_v9 }
 0x17a   : > { %4460 = vmatprep.mubr.msk.bf16.mxu1 %vm4988_vm1, %v4987_v9  ;;  %4484 = vmatprep.mubr.msk.bf16.mxu0 %vm4988_vm1, %v4987_v9 }
 0x17c   : > { %4459 = vmatpush3.bf16.msra.mxu1 %v4835_v36  ;;  %4483 = vmatpush3.bf16.msra.mxu0 %v4836_v37 }
 0x17d   : > { %4472 = vmatprep.subr.bf16.mxu1 %v4987_v9  ;;  %4496 = vmatprep.subr.bf16.mxu0 %v4987_v9 }
 0x17f   : > { %4461 = vmatmul.mubr.msk.bf16.vlgmr.msra.gmra.mrb[16].mxu1 %vm642_vm0, %v5191_v23  ;;  %4485 = vmatmul.mubr.msk.bf16.vlgmr.msra.gmra.mrb[16].mxu0 %vm642_vm0, %v5191_v23 }
 0x180   : > { %4473 = vmatpush3.bf16.msra.mxu1 %v4837_v38  ;;  %4476 = vmatprep.mubr.msk.bf16.mxu1 %vm4988_vm1, %v4987_v9 }
 0x181   : > { %4474 = vmatprep.subr.bf16.mxu1 %v4987_v9  ;;  %4498 = vmatprep.mubr.msk.bf16.mxu0 %vm4988_vm1, %v4987_v9 }
 0x184   : > { %4475 = vmatpush3.bf16.msra.mxu1 %v4838_v39 }
 0x185   : > { %4488 = vmatprep.subr.bf16.mxu1 %v4987_v9 }
 0x187   : > { %4477 = vmatmul.mubr.msk.bf16.vlgmr.msra.gmra.mrb[20].mxu1 %vm642_vm0, %v5191_v23 }
 0x188   : > { %4489 = vmatpush3.bf16.msra.mxu1 %v4839_v40  ;;  %4492 = vmatprep.mubr.msk.bf16.mxu1 %vm4988_vm1, %v4987_v9 }
 0x189   : > { %4490 = vmatprep.subr.bf16.mxu1 %v4987_v9 }
 0x18c   : > { %4491 = vmatpush3.bf16.msra.mxu1 %v4840_v41 }
 0x18d   : > { %4502 = vmatprep.subr.bf16.mxu1 %v4987_v9 }
 0x18f   : > { %4493 = vmatmul.mubr.msk.bf16.vlgmr.msra.gmra.mrb[24].mxu1 %vm642_vm0, %v5191_v23 }
 0x190   : > { %4504 = vmatprep.mubr.msk.bf16.mxu1 %vm4988_vm1, %v4987_v9 }
 0x232   : > { %v766_v42 = vpop.f32.mrb[0].mxu1  ;;  %v870_v43 = vpop.f32.mrb[0].mxu0 }
 0x233   : > { %v4406_v44 = vpop.f32.mrb[1].mxu1  ;;  %v4422_v45 = vpop.f32.mrb[1].mxu0  ;;  %v767_v0 = vadd.f32 %v4027_v61, %v766_v42  ;;  %v871_v17 = vadd.f32 %v4029_v13, %v870_v43 }
 0x234   : > { %v769_v46 = vpop.f32.mrb[2].mxu1  ;;  %v873_v47 = vpop.f32.mrb[2].mxu0 }
 0x235   : > { %v4407_v48 = vpop.f32.mrb[3].mxu1  ;;  %v4423_v49 = vpop.f32.mrb[3].mxu0  ;;  %v1432_v8 = vpack.c.bf16 %v767_v0, %v767_v0  ;;  %v1434_v27 = vpack.c.bf16 %v871_v17, %v871_v17  ;;  %v5377_v0 = vld [vmem:[%s637_s28] ss:$0 sm:$0xff]  ;;  %s4923_s28 = scalar_lea.vmem %s5844_s26, 16 }
 0x236   : > { %v4030_v48 = vld [vmem:[%s5889_s5 + $0x3] ss:$0 sm:$0xff]  ;;  %p4924_p11 = scmp.ne.s32.totalorder %s5844_s26, %s4923_s28  ;;  %p4931_p1 = scmp.lt.s32.totalorder %s4929_s1, %s4923_s28 }
 0x238   : > { %p4925_p12 = pnand %p4924_p11, %p5133_p5  ;;  %p4932_p2 = por %p4931_p1, %p4930_p0 }
 0x23a   : > { %v818_v51 = vpop.f32.mrb[4].mxu1  ;;  %v1018_v52 = vpop.f32.mrb[4].mxu0  ;;  %p4926_p13 = pneg %p4925_p12 }
 0x23b   : > { %v1019_v53 = vadd.f32 %v4043_v50, %v1018_v52  ;;  %v4414_v54 = vpop.f32.mrb[5].mxu1  ;;  %v4438_v55 = vpop.f32.mrb[5].mxu0  ;;  %v819_v36 = vadd.f32 %v4028_v32, %v818_v51  ;;  %v4060_v50 = vld [vmem:[%s5893_s9 + $0x1] ss:$0 sm:$0xff] }
 0x23c   : > { %v821_v56 = vpop.f32.mrb[6].mxu1  ;;  %v1021_v57 = vpop.f32.mrb[6].mxu0  ;;  %p4933_p3 = pnand %p4932_p2, %p4926_p13 }
 0x23d   : > { %v1436_v58 = vpack.c.bf16 %v1019_v53, %v1019_v53  ;;  %v4415_v59 = vpop.f32.mrb[7].mxu1  ;;  %v4439_v60 = vpop.f32.mrb[7].mxu0  ;;  %v1433_v44 = vpack.c.bf16 %v819_v36, %v819_v36 }
 0x23f   : > { %v1445_v62 = vsel %vm1440_vm2, %v1436_v58, 0 }
 0x240   : > { %4497 = vmatpush3.bf16.xpose.msra.mxu0 %v1445_v62 }
 0x241   : > { %4508 = vmatprep.subr.bf16.mxu0 %v4987_v9 }
 0x242   : > { %v922_v1 = vpop.f32.mrb[8].mxu1  ;;  %v1122_v2 = vpop.f32.mrb[8].mxu0 }
 0x243   : > { %v1123_v3 = vadd.f32 %v4045_v63, %v1122_v2  ;;  %v4430_v4 = vpop.f32.mrb[9].mxu1  ;;  %v4454_v5 = vpop.f32.mrb[9].mxu0  ;;  %v923_v51 = vadd.f32 %v4030_v48, %v922_v1 }
 0x244   : > { %v925_v6 = vpop.f32.mrb[10].mxu1  ;;  %v1125_v7 = vpop.f32.mrb[10].mxu0 }
 0x245   : > { %v1438_v10 = vpack.c.bf16 %v1123_v3, %v1123_v3  ;;  %v4431_v11 = vpop.f32.mrb[11].mxu1  ;;  %v4455_v12 = vpop.f32.mrb[11].mxu0  ;;  %v1435_v56 = vpack.c.bf16 %v923_v51, %v923_v51 }
 0x247   : > { %v1537_v14 = vsel %vm1440_vm2, %v1438_v10, 0  ;;  %4499 = vmatmul.mubr.msk.bf16.vlgmr.msra.gmra.mrb[20].mxu0 %vm1440_vm2, %v1432_v8 }
 0x248   : > { %4509 = vmatpush3.bf16.xpose.msra.mxu0 %v1537_v14  ;;  %4510 = vmatprep.mubr.msk.bf16.mxu0 %vm4988_vm1, %v4987_v9 }
 0x249   : > { %4520 = vmatprep.subr.bf16.mxu0 %v4987_v9 }
 0x24a   : > { %v1070_v18 = vpop.f32.mrb[12].mxu1  ;;  %v1270_v19 = vpop.f32.mrb[12].mxu0 }
 0x24b   : > { %v1071_v21 = vadd.f32 %v4044_v15, %v1070_v18  ;;  %v1271_v22 = vadd.f32 %v4059_v16, %v1270_v19  ;;  %v4446_v23 = vpop.f32.mrb[13].mxu1  ;;  %v4470_v24 = vpop.f32.mrb[13].mxu0 }
 0x24c   : > { %v1073_v25 = vpop.f32.mrb[14].mxu1  ;;  %v1273_v26 = vpop.f32.mrb[14].mxu0 }
 0x24d   : > { %v1437_v28 = vpack.c.bf16 %v1071_v21, %v1071_v21  ;;  %v1687_v29 = vpack.c.bf16 %v1271_v22, %v1271_v22  ;;  %v4447_v30 = vpop.f32.mrb[15].mxu1  ;;  %v4471_v31 = vpop.f32.mrb[15].mxu0 }
 0x24f   : > { %v1491_v33 = vsel %vm1440_vm2, %v1437_v28, 0  ;;  %v1696_v34 = vsel %vm1694_vm3, %v1687_v29, 0  ;;  %4511 = vmatmul.mubr.msk.bf16.vlgmr.msra.gmra.mrb[24].mxu0 %vm1440_vm2, %v1434_v27 }
 0x250   : > { %4503 = vmatpush3.bf16.xpose.msra.mxu1 %v1491_v33  ;;  %4521 = vmatpush3.bf16.msra.mxu0 %v1696_v34 }
 0x251   : > { %4514 = vmatprep.subr.bf16.mxu1 %v4987_v9  ;;  %4522 = vmatprep.mubr.msk.bf16.mxu0 %vm4988_vm1, %v4987_v9 }
 0x252   : > { %v1174_v37 = vpop.f32.mrb[16].mxu1  ;;  %v5352_v38 = vpop.f32.mrb[16].mxu0  ;;  %4532 = vmatprep.subr.bf16.mxu0 %v4987_v9 }
 0x253   : > { %v1175_v39 = vadd.f32 %v4046_v35, %v1174_v37  ;;  %v4462_v40 = vpop.f32.mrb[17].mxu1  ;;  %v4486_v41 = vpop.f32.mrb[17].mxu0 }
 0x254   : > { %v1177_v42 = vpop.f32.mrb[18].mxu1  ;;  %v1377_v43 = vpop.f32.mrb[18].mxu0 }
 0x255   : > { %v1439_v45 = vpack.c.bf16 %v1175_v39, %v1175_v39  ;;  %v4463_v46 = vpop.f32.mrb[19].mxu1  ;;  %v4487_v47 = vpop.f32.mrb[19].mxu0 }
 0x257   : > { %v1583_v49 = vsel %vm1440_vm2, %v1439_v45, 0  ;;  %4505 = vmatmul.mubr.msk.bf16.vlgmr.msra.gmra.mrb[28].mxu1 %vm1440_vm2, %v1433_v44 }
 0x258   : > { %4515 = vmatpush3.bf16.xpose.msra.mxu1 %v1583_v49  ;;  %4516 = vmatprep.mubr.msk.bf16.mxu1 %vm4988_vm1, %v4987_v9 }
 0x259   : > { %4526 = vmatprep.subr.bf16.mxu1 %v4987_v9 }
 0x25a   : > { %v1322_v52 = vpop.f32.mrb[20].mxu1 }
 0x25b   : > { %v1323_v53 = vadd.f32 %v4060_v50, %v1322_v52  ;;  %v4478_v54 = vpop.f32.mrb[21].mxu1 }
 0x25c   : > { %v1325_v55 = vpop.f32.mrb[22].mxu1 }
 0x25d   : > { %v1688_v57 = vpack.c.bf16 %v1323_v53, %v1323_v53  ;;  %v4479_v58 = vpop.f32.mrb[23].mxu1  ;;  %v4061_v53 = vld [vmem:[%s5893_s9 + $0x2] ss:$0 sm:$0xff] }
 0x25e   : > { %v1375_v54 = vadd.f32 %v4061_v53, %v5352_v38 }
 0x25f   : > { %v1742_v59 = vsel %vm1694_vm3, %v1688_v57, 0  ;;  %4517 = vmatmul.mubr.msk.bf16.vlgmr.msra.gmra.mrb[32].mxu1 %vm1440_vm2, %v1435_v56 }
 0x260   : > { %4527 = vmatpush3.bf16.msra.mxu1 %v1742_v59  ;;  %4528 = vmatprep.mubr.msk.bf16.mxu1 %vm4988_vm1, %v4987_v9  ;;  %v1689_v57 = vpack.c.bf16 %v1375_v54, %v1375_v54 }
 0x261   : > { %4538 = vmatprep.subr.bf16.mxu1 %v4987_v9 }
 0x262   : > { %v5371_v60 = vpop.f32.mrb[24].mxu1 }
 0x263   : > { %v4494_v61 = vpop.f32.mrb[25].mxu1 }
 0x264   : > { %v1429_v62 = vpop.f32.mrb[26].mxu1  ;;  %v1788_v61 = vsel %vm1694_vm3, %v1689_v57, 0 }
 0x265   : > { %v4495_v63 = vpop.f32.mrb[27].mxu1 }
 0x31a   : > { %v1481_v1 = vpop.f32.mrb[20].mxu0 }
 0x31b   : > { %v1625_v2 = vmul.f32 0.35355338, %v1481_v1  ;;  %v4500_v3 = vpop.f32.mrb[21].mxu0  ;;  %v4062_v1 = vld [vmem:[%s5893_s9 + $0x3] ss:$0 sm:$0xff] }
 0x31c   : > { %v1484_v4 = vpop.f32.mrb[22].mxu0  ;;  %v1427_v3 = vadd.f32 %v4062_v1, %v5371_v60 }
 0x31d   : > { %v4501_v5 = vpop.f32.mrb[23].mxu0  ;;  %v1635_v6 = vadd.f32 %v5377_v0, %v1625_v2 }
 0x31f   : > { %v1639_v7 = vsel %vm1440_vm2, %v1635_v6, -inf }
 0x320   : > { %1640 = vmax.xlane.f32.xlu1 %v1639_v7 }
 0x322   : > { %v1573_v8 = vpop.f32.mrb[24].mxu0 }
 0x323   : > { %v1627_v10 = vmul.f32 0.35355338, %v1573_v8  ;;  %v4512_v11 = vpop.f32.mrb[25].mxu0 }
 0x324   : > { %v1576_v12 = vpop.f32.mrb[26].mxu0 }
 0x325   : > { %v4513_v13 = vpop.f32.mrb[27].mxu0  ;;  %v1637_v14 = vadd.f32 %v5377_v0, %v1627_v10 }
 0x326   : > { %v1880_v13 = vld [vmem:[%s5894_s10] sm:$0xf] }
 0x327   : > { %v1645_v15 = vsel %vm1440_vm2, %v1637_v14, -inf }
 0x328   : > { %1646 = vmax.xlane.f32.xlu0 %v1645_v15  ;;  %v1881_v15 = vld [vmem:[%s5894_s10 + $0x4] sm:$0xf] }
 0x32a   : > { %v1527_v16 = vpop.f32.mrb[28].mxu1 }
 0x32b   : > { %v1626_v17 = vmul.f32 0.35355338, %v1527_v16  ;;  %v4506_v18 = vpop.f32.mrb[29].mxu1  ;;  %v1934_v16 = vsel %vm1694_vm3, %v1881_v15, 0 }
 0x32c   : > { %v1530_v19 = vpop.f32.mrb[30].mxu1 }
 0x32d   : > { %v4507_v21 = vpop.f32.mrb[31].mxu1  ;;  %v1636_v22 = vadd.f32 %v5377_v0, %v1626_v17  ;;  %v1882_v17 = vld [vmem:[%s5894_s10 + $0x8] sm:$0xf] }
 0x32f   : > { %v1642_v23 = vsel %vm1440_vm2, %v1636_v22, -inf }
 0x330   : > { %1643 = vmax.xlane.f32.xlu1 %v1642_v23 }
 0x332   : > { %v1619_v24 = vpop.f32.mrb[32].mxu1 }
 0x333   : > { %v1628_v25 = vmul.f32 0.35355338, %v1619_v24  ;;  %v4518_v26 = vpop.f32.mrb[33].mxu1 }
 0x334   : > { %v1622_v27 = vpop.f32.mrb[34].mxu1 }
 0x335   : > { %v4519_v28 = vpop.f32.mrb[35].mxu1  ;;  %v1638_v29 = vadd.f32 %v5377_v0, %v1628_v25 }
 0x337   : > { %v1648_v30 = vsel %vm1440_vm2, %v1638_v29, -inf }
 0x338   : > { %1649 = vmax.xlane.f32.xlu1 %v1648_v30  ;;  %v1883_v30 = vld [vmem:[%s5894_s10 + $0xc] sm:$0xf] }
 0x3ad   : > { %v1641_v31 = vpop.xlane.xlu1 %1640 }
 0x3ae   : > { %v1651_v32 = vsub.f32 %v1635_v6, %v1641_v31  ;;  %v1690_v6 = vpack.c.bf16 %v1427_v3, %v1427_v3 }
 0x3b0   : > { %v1655_v33 = vmul.f32 1.442695, %v1651_v32  ;;  %v1834_v10 = vsel %vm1694_vm3, %v1690_v6, 0 }
 0x3b2   : > { %4879 = vpow2.f32 %v1655_v33 }
 0x3b5   : > { %v1647_v34 = vpop.xlane.xlu0 %1646 }
 0x3b6   : > { %v1653_v35 = vsub.f32 %v1637_v14, %v1647_v34  ;;  %v1888_v14 = vsel %vm1694_vm3, %v1880_v13, 0  ;;  %v2026_v34 = vsel %vm1694_vm3, %v1883_v30, 0  ;;  %v4842_v13 = vld [vmem:[%s5898_s14 + $0x8] sm:$0xff]  }
 0x3b8   : > { %v1659_v36 = vmul.f32 1.442695, %v1653_v35 }
 0x3ba   : > { %4881 = vpow2.f32 %v1659_v36 }
 0x3bc   : > { %v4880_v37 = vpop.eup %4879 }
 0x3bd   : > { %v1644_v39 = vpop.xlane.xlu1 %1643  ;;  %v1663_v40 = vsel %vm1440_vm2, %v4880_v37, 0.0 }
 0x3be   : > { %v1652_v41 = vsub.f32 %v1636_v22, %v1644_v39  ;;  %1664 = vadd.xlane.f32.xlu0 %v1663_v40  ;;  %v1980_v22 = vsel %vm1694_vm3, %v1882_v17, 0  ;;  %v4089_v17 = vld [vmem:[%s5896_s12] ss:$0 sm:$0xff] }
 0x3c0   : > { %v1657_v42 = vmul.f32 1.442695, %v1652_v41 }
 0x3c2   : > { %4883 = vpow2.f32 %v1657_v42 }
 0x3c4   : > { %v4882_v43 = vpop.eup %4881 }
 0x3c5   : > { %v1650_v44 = vpop.xlane.xlu1 %1649  ;;  %v1669_v45 = vsel %vm1440_vm2, %v4882_v43, 0.0 }
 0x3c6   : > { %v1654_v46 = vsub.f32 %v1638_v29, %v1650_v44  ;;  %1670 = vadd.xlane.f32.xlu0 %v1669_v45 }
 0x3c8   : > { %v1661_v47 = vmul.f32 1.442695, %v1654_v46 }
 0x3ca   : > { %4885 = vpow2.f32 %v1661_v47 }
 0x3cc   : > { %v4884_v48 = vpop.eup %4883 }
 0x3cd   : > { %v1666_v49 = vsel %vm1440_vm2, %v4884_v48, 0.0 }
 0x3ce   : > { %1667 = vadd.xlane.f32.xlu1 %v1666_v49 }
 0x3d4   : > { %v4886_v50 = vpop.eup %4885 }
 0x3d5   : > { %v1672_v51 = vsel %vm1440_vm2, %v4886_v50, 0.0 }
 0x3d6   : > { %1673 = vadd.xlane.f32.xlu1 %v1672_v51 }
 0x44b   : > { %v1665_v52 = vpop.xlane.xlu0 %1664 }
 0x44c   : > { %4887 = vrcp.f32 %v1665_v52 }
 0x453   : > { %v1671_v55 = vpop.xlane.xlu0 %1670 }
 0x454   : > { %4889 = vrcp.f32 %v1671_v55 }
 0x456   : > { %v4888_v56 = vpop.eup %4887 }
 0x457   : > { %v1679_v58 = vmul.f32 %v4888_v56, %v4880_v37 }
 0x459   : > { %v1683_v59 = vpack.c.bf16 %v1679_v58, %v1679_v58 }
 0x45b   : > { %4523 = vmatmul.mubr.msk.bf16.vlgmr.msra.gmra.mrb[28].mxu0 %vm1440_vm2, %v1683_v59  ;;  %v1668_v62 = vpop.xlane.xlu1 %1667 }
 0x45c   : > { %4533 = vmatpush3.bf16.msra.mxu0 %v1788_v61  ;;  %4891 = vrcp.f32 %v1668_v62  ;;  %4534 = vmatprep.mubr.msk.bf16.mxu0 %vm4988_vm1, %v4987_v9 }
 0x45d   : > { %4544 = vmatprep.subr.bf16.mxu0 %v4987_v9 }
 0x45e   : > { %v4890_v63 = vpop.eup %4889 }
 0x45f   : > { %v1681_v38 = vmul.f32 %v4890_v63, %v4882_v43  ;;  %v4088_v63 = vld [vmem:[%s5895_s11] ss:$0 sm:$0xff] }
 0x461   : > { %v1685_v2 = vpack.c.bf16 %v1681_v38, %v1681_v38 }
 0x463   : > { %4535 = vmatmul.mubr.msk.bf16.vlgmr.msra.gmra.mrb[32].mxu0 %vm1440_vm2, %v1685_v2  ;;  %v1674_v4 = vpop.xlane.xlu1 %1673 }
 0x464   : > { %4893 = vrcp.f32 %v1674_v4  ;;  %4546 = vmatprep.mubr.msk.bf16.mxu0 %vm4988_vm1, %v4987_v9  ;;  %4545 = vmatpush3.bf16.msra.mxu0 %v1888_v14 }
 0x465   : > { %4556 = vmatprep.subr.bf16.mxu0 %v4987_v9 }
 0x466   : > { %v4892_v5 = vpop.eup %4891 }
 0x467   : > { %v1680_v7 = vmul.f32 %v4892_v5, %v4884_v48 }
 0x469   : > { %v1684_v8 = vpack.c.bf16 %v1680_v7, %v1680_v7 }
 0x46b   : > { %4529 = vmatmul.mubr.msk.bf16.vlgmr.msra.gmra.mrb[36].mxu1 %vm1440_vm2, %v1684_v8 }
 0x46c   : > { %4539 = vmatpush3.bf16.msra.mxu1 %v1834_v10  ;;  %4540 = vmatprep.mubr.msk.bf16.mxu1 %vm4988_vm1, %v4987_v9 }
 0x46d   : > { %4550 = vmatprep.subr.bf16.mxu1 %v4987_v9 }
 0x46e   : > { %v4894_v60 = vpop.eup %4893 }
 0x46f   : > { %v1682_v11 = vmul.f32 %v4894_v60, %v4886_v50 }
 0x471   : > { %v1686_v12 = vpack.c.bf16 %v1682_v11, %v1682_v11 }
 0x473   : > { %4541 = vmatmul.mubr.msk.bf16.vlgmr.msra.gmra.mrb[40].mxu1 %vm1440_vm2, %v1686_v12  ;;  %v4841_v12 = vld [vmem:[%s5898_s14] sm:$0xff]  }
 0x474   : > { %4552 = vmatprep.mubr.msk.bf16.mxu1 %vm4988_vm1, %v4987_v9  ;;  %4551 = vmatpush3.bf16.msra.mxu1 %v1934_v16 }
 0x475   : > { %4562 = vmatprep.subr.bf16.mxu1 %v4987_v9 }
 0x52e   : > { %v1732_v18 = vpop.f32.mrb[28].mxu0 }
 0x52f   : > { %v1876_v19 = vpack.c.bf16 %v1732_v18, %v1732_v18  ;;  %v4524_v21 = vpop.f32.mrb[29].mxu0 }
 0x530   : > { %v1735_v23 = vpop.f32.mrb[30].mxu0 }
 0x531   : > { %v4525_v24 = vpop.f32.mrb[31].mxu0  ;;  %4547 = vmatmul.mubr.msk.bf16.vlgmr.msra.gmra.mrb[36].mxu0 %vm1440_vm2, %v1876_v19  ;;  %v4090_v19 = vld [vmem:[%s5897_s13] ss:$0 sm:$0xff] }
 0x532   : > { %4557 = vmatpush3.bf16.msra.mxu0 %v1980_v22  ;;  %4558 = vmatprep.mubr.msk.bf16.mxu0 %vm4988_vm1, %v4987_v9  ;;  %v4843_v24 = vld [vmem:[%s5900_s16] sm:$0xff]  }
 0x533   : > { %4568 = vmatprep.subr.bf16.mxu0 %v4987_v9 }
 0x536   : > { %v1824_v25 = vpop.f32.mrb[32].mxu0 }
 0x537   : > { %v1878_v26 = vpack.c.bf16 %v1824_v25, %v1824_v25  ;;  %v4536_v27 = vpop.f32.mrb[33].mxu0  ;;  %v4844_v25 = vld [vmem:[%s5900_s16 + $0x8] sm:$0xff]  }
 0x538   : > { %v1827_v28 = vpop.f32.mrb[34].mxu0  ;;  %v4846_v27 = vld [vmem:[%s5900_s16 + $0x18] sm:$0xff]  }
 0x539   : > { %v4537_v29 = vpop.f32.mrb[35].mxu0  ;;  %4559 = vmatmul.mubr.msk.bf16.vlgmr.msra.gmra.mrb[40].mxu0 %vm1440_vm2, %v1878_v26  ;;  %v4845_v26 = vld [vmem:[%s5900_s16 + $0x10] sm:$0xff]   ;;  %v4091_v28 = vld [vmem:[%s5899_s15] ss:$0 sm:$0xff] }
 0x53a   : > { %4572 = vmatprep.mubr.msk.bf16.mxu0 %vm4988_vm1, %v4987_v9  ;;  %4569 = vmatpush3.bf16.msra.mxu0 %v4841_v12  ;;  %v4854_v12 = vld [vmem:[%s5890_s6 + $0x48] sm:$0xff]  }
 0x53b   : > { %4570 = vmatprep.subr.bf16.mxu0 %v4987_v9 }
 0x53e   : > { %v1778_v31 = vpop.f32.mrb[36].mxu1  ;;  %4571 = vmatpush3.bf16.msra.mxu0 %v4842_v13  ;;  %v4855_v13 = vld [vmem:[%s5926_s3 + $0x70] sm:$0xff]  }
 0x53f   : > { %v1877_v32 = vpack.c.bf16 %v1778_v31, %v1778_v31  ;;  %v4530_v33 = vpop.f32.mrb[37].mxu1  ;;  %4588 = vmatprep.subr.bf16.mxu0 %v4987_v9 }
 0x540   : > { %v1781_v35 = vpop.f32.mrb[38].mxu1 }
 0x541   : > { %v4531_v36 = vpop.f32.mrb[39].mxu1  ;;  %4553 = vmatmul.mubr.msk.bf16.vlgmr.msra.gmra.mrb[44].mxu1 %vm1440_vm2, %v1877_v32 }
 0x542   : > { %4563 = vmatpush3.bf16.msra.mxu1 %v2026_v34  ;;  %4564 = vmatprep.mubr.msk.bf16.mxu1 %vm4988_vm1, %v4987_v9 }
 0x543   : > { %4576 = vmatprep.subr.bf16.mxu1 %v4987_v9 }
 0x546   : > { %v1870_v37 = vpop.f32.mrb[40].mxu1 }
 0x547   : > { %v1879_v39 = vpack.c.bf16 %v1870_v37, %v1870_v37  ;;  %v4542_v40 = vpop.f32.mrb[41].mxu1 }
 0x548   : > { %v1873_v41 = vpop.f32.mrb[42].mxu1 }
 0x549   : > { %v4543_v42 = vpop.f32.mrb[43].mxu1  ;;  %4565 = vmatmul.mubr.msk.bf16.vlgmr.msra.gmra.mrb[48].mxu1 %vm1440_vm2, %v1879_v39 }
 0x54a   : > { %4584 = vmatprep.mubr.msk.bf16.mxu1 %vm4988_vm1, %v4987_v9  ;;  %4577 = vmatpush3.bf16.msra.mxu1 %v4843_v24  ;;  %v4866_v24 = vld [vmem:[%s5892_s8 + $0x68] sm:$0xff]  }
 0x54b   : > { %4578 = vmatprep.subr.bf16.mxu1 %v4987_v9 }
 0x54e   : > { %4579 = vmatpush3.bf16.msra.mxu1 %v4844_v25  ;;  %v4867_v25 = vld [vmem:[%s5892_s8 + $0x50] sm:$0xff]  }
 0x54f   : > { %4580 = vmatprep.subr.bf16.mxu1 %v4987_v9 }
 0x552   : > { %4581 = vmatpush3.bf16.msra.mxu1 %v4845_v26  ;;  %v4868_v26 = vld [vmem:[%s5892_s8 + $0x58] sm:$0xff]  }
 0x553   : > { %4582 = vmatprep.subr.bf16.mxu1 %v4987_v9 }
 0x556   : > { %4583 = vmatpush3.bf16.msra.mxu1 %v4846_v27  ;;  %v4869_v27 = vld [vmem:[%s5892_s8 + $0x70] sm:$0xff]  }
 0x557   : > { %4604 = vmatprep.subr.bf16.mxu1 %v4987_v9 }
 0x604   : > { %v1924_v43 = vpop.f32.mrb[36].mxu0 }
 0x605   : > { %v4548_v44 = vpop.f32.mrb[37].mxu0  ;;  %v2068_v52 = vsel %vm642_vm0, %v1924_v43, 0.0 }
 0x606   : > { %v1927_v45 = vpop.f32.mrb[38].mxu0 }
 0x607   : > { %v4549_v46 = vpop.f32.mrb[39].mxu0  ;;  %v4095_v45 = vld [vmem:[%s5901_s17] ss:$0 sm:$0xff] }
 0x60c   : > { %v2016_v47 = vpop.f32.mrb[40].mxu0 }
 0x60d   : > { %v4560_v48 = vpop.f32.mrb[41].mxu0  ;;  %v2071_v57 = vsel %vm642_vm0, %v2016_v47, 0.0 }
 0x60e   : > { %v2019_v49 = vpop.f32.mrb[42].mxu0 }
 0x60f   : > { %v4561_v50 = vpop.f32.mrb[43].mxu0 }
 0x614   : > { %v1970_v51 = vpop.f32.mrb[44].mxu1 }
 0x615   : > { %v2069_v53 = vsel %vm642_vm0, %v1970_v51, 0.0  ;;  %v4554_v54 = vpop.f32.mrb[45].mxu1 }
 0x616   : > { %v2070_v55 = vadd.f32 %v2069_v53, %v2068_v52  ;;  %v1973_v56 = vpop.f32.mrb[46].mxu1 }
 0x617   : > { %v4555_v58 = vpop.f32.mrb[47].mxu1 }
 0x618   : > { %v2072_v59 = vadd.f32 %v2071_v57, %v2070_v55  ;;  %v4847_v58 = vld [vmem:[%s5926_s3 + $0x40] sm:$0xff]  }
 0x61c   : > { %v2062_v61 = vpop.f32.mrb[48].mxu1 }
 0x61d   : > { %v2073_v62 = vsel %vm642_vm0, %v2062_v61, 0.0  ;;  %v4566_v38 = vpop.f32.mrb[49].mxu1  ;;  %v4849_v61 = vld [vmem:[%s5926_s3 + $0x48] sm:$0xff]  }
 0x61e   : > { %v2074_v1 = vadd.f32 %v2073_v62, %v2072_v59  ;;  %v2065_v2 = vpop.f32.mrb[50].mxu1  ;;  %v4848_v59 = vld [vmem:[%s5926_s3 + $0x60] sm:$0xff]   ;;  %v4850_v62 = vld [vmem:[%s5926_s3 + $0x68] sm:$0xff]  }
 0x61f   : > { %v4567_v3 = vpop.f32.mrb[51].mxu1 }
 0x620   : > { %v2082_v4 = vadd.f32 %v4088_v63, %v2074_v1  ;;  %v4101_v3 = vld [vmem:[%s5902_s18] ss:$0 sm:$0xff] }
 0x622   : > { %v2083_v5 = vadd.f32 %v2082_v4, %v5181_v20 }
 0x624   : > { %v2086_v6 = vsel %vm642_vm0, %v2083_v5, 0.0 }
 0x625   : > { %2087 = vadd.xlane.f32.xlu0 %v2086_v6 }
 0x6b2   : > { %v2088_v7 = vpop.xlane.xlu0 %2087 }
 0x6b3   : > { %v2089_v8 = vmul.f32 0.03125, %v2088_v7 }
 0x6b5   : > { %v2090_v10 = vsub.f32 %v2083_v5, %v2089_v8  ;;  %v4102_v5 = vld [vmem:[%s5903_s19] ss:$0 sm:$0xff]  ;;  %v4851_v8 = vld [vmem:[%s5926_s3 + $0x50] sm:$0xff]  }
 0x6b7   : > { %v2091_v60 = vmul.f32 %v2090_v10, %v2090_v10 }
 0x6b9   : > { %v2092_v11 = vsel %vm642_vm0, %v2091_v60, 0.0 }
 0x6ba   : > { %2093 = vadd.xlane.f32.xlu1 %v2092_v11  ;;  %v4853_v11 = vld [vmem:[%s5926_s3 + $0x58] sm:$0xff]  }
 0x747   : > { %v2094_v20 = vpop.xlane.xlu1 %2093 }
 0x748   : > { %v2095_v14 = vmul.f32 0.03125, %v2094_v20  ;;  %v4856_v20 = vld [vmem:[%s5890_s6 + $0x60] sm:$0xff]  }
 0x74a   : > { %v2096_v15 = vadd.f32 1e-12, %v2095_v14  ;;  %v4857_v14 = vld [vmem:[%s5926_s3 + $0x78] sm:$0xff]  }
 0x74c   : > { %4895 = vrsqrt.f32 %v2096_v15  ;;  %v4858_v15 = vld [vmem:[%s5890_s6 + $0x68] sm:$0xff]  }
 0x756   : > { %v4896_v16 = vpop.eup %4895 }
 0x757   : > { %v2098_v18 = vmul.f32 %v4896_v16, %v2090_v10  ;;  %v4852_v10 = vld [vmem:[%s5890_s6 + $0x40] sm:$0xff]   ;;  %v4859_v16 = vld [vmem:[%s5890_s6 + $0x50] sm:$0xff]  }
 0x759   : > { %v2105_v21 = vmul.f32 %v4089_v17, %v2098_v18  ;;  %v4860_v17 = vld [vmem:[%s5892_s8 + $0x40] sm:$0xff]   ;;  %v4861_v18 = vld [vmem:[%s5890_s6 + $0x58] sm:$0xff]  }
 0x75b   : > { %v2112_v22 = vadd.f32 %v4090_v19, %v2105_v21  ;;  %v4862_v19 = vld [vmem:[%s5892_s8 + $0x48] sm:$0xff]   ;;  %v4863_v21 = vld [vmem:[%s5890_s6 + $0x70] sm:$0xff]  }
 0x75d   : > { %v2113_v23 = vpack.c.bf16 %v2112_v22, %v2112_v22 }
 0x75f   : > { %4573 = vmatmul.mubr.msk.bf16.vlgmr.msra.gmra.mrb[44].mxu0 %vm642_vm0, %v2113_v23  ;;  %v4865_v23 = vld [vmem:[%s5890_s6 + $0x78] sm:$0xff]  }
 0x760   : > { %4592 = vmatprep.mubr.msk.bf16.mxu0 %vm4988_vm1, %v4987_v9  ;;  %4589 = vmatpush3.bf16.msra.mxu0 %v4847_v58 }
 0x761   : > { %4590 = vmatprep.subr.bf16.mxu0 %v4987_v9 }
 0x764   : > { %4591 = vmatpush3.bf16.msra.mxu0 %v4849_v61 }
 0x765   : > { %4596 = vmatprep.subr.bf16.mxu0 %v4987_v9 }
 0x832   : > { %v2174_v29 = vpop.f32.mrb[44].mxu0 }
 0x833   : > { %v2175_v30 = vadd.f32 %v4091_v28, %v2174_v29  ;;  %v4574_v31 = vpop.f32.mrb[45].mxu0  ;;  %v4870_v28 = vld [vmem:[%s5892_s8 + $0x78] sm:$0xff]  }
 0x834   : > { %v2177_v32 = vpop.f32.mrb[46].mxu0 }
 0x835   : > { %v2181_v33 = vmul.f32 0.044715, %v2175_v30  ;;  %v4575_v34 = vpop.f32.mrb[47].mxu0  ;;  %v2180_v41 = vmul.f32 0.5, %v2175_v30 }
 0x837   : > { %v2182_v35 = vmul.f32 %v2181_v33, %v2175_v30 }
 0x839   : > { %v2183_v36 = vmul.f32 %v2182_v35, %v2175_v30 }
 0x83b   : > { %v2184_v37 = vadd.f32 %v2183_v36, %v2175_v30 }
 0x83d   : > { %v2185_v39 = vmul.f32 0.7978846, %v2184_v37  ;;  %v4159_v37 = vld [vmem:[%s5891_s7 + $0x4] ss:$0 sm:$0xff] }
 0x83f   : > { %4897 = vtanh.f32 %v2185_v39 }
 0x849   : > { %v4898_v40 = vpop.eup %4897 }
 0x84a   : > { %v2187_v42 = vadd.f32 1.0, %v4898_v40 }
 0x84c   : > { %v2188_v43 = vmul.f32 %v2187_v42, %v2180_v41 }
 0x84e   : > { %v2189_v44 = vpack.c.bf16 %v2188_v43, %v2188_v43 }
 0x850   : > { %4585 = vmatmul.mubr.msk.bf16.vlgmr.msra.gmra.mrb[52].mxu1 %vm2229_vm4, %v2189_v44 }
 0x851   : > { %4608 = vmatprep.mubr.msk.bf16.mxu1 %vm4988_vm1, %v4987_v9  ;;  %4605 = vmatpush3.bf16.msra.mxu1 %v4848_v59 }
 0x852   : > { %4606 = vmatprep.subr.bf16.mxu1 %v4987_v9 }
 0x855   : > { %4607 = vmatpush3.bf16.msra.mxu1 %v4850_v62 }
 0x856   : > { %4620 = vmatprep.subr.bf16.mxu1 %v4987_v9 }
 0x923   : > { %v2267_v46 = vpop.f32.mrb[52].mxu1 }
 0x924   : > { %v2268_v47 = vadd.f32 %v4095_v45, %v2267_v46  ;;  %v4586_v48 = vpop.f32.mrb[53].mxu1 }
 0x925   : > { %v2270_v49 = vpop.f32.mrb[54].mxu1 }
 0x926   : > { %v4587_v50 = vpop.f32.mrb[55].mxu1  ;;  %v2273_v51 = vadd.f32 %v2268_v47, %v2112_v22  ;;  %v4864_v22 = vld [vmem:[%s5892_s8 + $0x60] sm:$0xff]  }
 0x927   : > { %v4123_v49 = vld [vmem:[%s5889_s5 + $0x4] ss:$0 sm:$0xff] }
 0x928   : > { %v2276_v52 = vsel %vm642_vm0, %v2273_v51, 0.0 }
 0x929   : > { %2277 = vadd.xlane.f32.xlu0 %v2276_v52 }
 0x9b6   : > { %v2278_v53 = vpop.xlane.xlu0 %2277 }
 0x9b7   : > { %v2279_v54 = vmul.f32 0.03125, %v2278_v53 }
 0x9b9   : > { %v2280_v55 = vsub.f32 %v2273_v51, %v2279_v54  ;;  %v4161_v51 = vld [vmem:[%s5891_s7 + $0x6] ss:$0 sm:$0xff] }
 0x9bb   : > { %v2281_v56 = vmul.f32 %v2280_v55, %v2280_v55 }
 0x9bd   : > { %v2282_v57 = vsel %vm642_vm0, %v2281_v56, 0.0 }
 0x9be   : > { %2283 = vadd.xlane.f32.xlu1 %v2282_v57 }
 0xa4b   : > { %v2284_v63 = vpop.xlane.xlu1 %2283 }
 0xa4c   : > { %v2285_v38 = vmul.f32 0.03125, %v2284_v63 }
 0xa4e   : > { %v2286_v1 = vadd.f32 1e-12, %v2285_v38 }
 0xa50   : > { %4899 = vrsqrt.f32 %v2286_v1  ;;  %v4125_v1 = vld [vmem:[%s5889_s5 + $0x6] ss:$0 sm:$0xff] }
 0xa5a   : > { %v4900_v2 = vpop.eup %4899 }
 0xa5b   : > { %v2288_v4 = vmul.f32 %v4900_v2, %v2280_v55 }
 0xa5d   : > { %v2295_v6 = vmul.f32 %v4101_v3, %v2288_v4  ;;  %v4160_v3 = vld [vmem:[%s5891_s7 + $0x5] ss:$0 sm:$0xff]  ;;  %v4195_v4 = vld [vmem:[%s5893_s9 + $0x4] ss:$0 sm:$0xff] }
 0xa5f   : > { %v5523_v7 = vadd.f32 %v4102_v5, %v2295_v6 }
 0xa61   : > { %v5533_v60 = vpack.c.bf16 %v5523_v7, %v5523_v7 }
 0xa63   : > { %4593 = vmatmul.mubr.msk.bf16.vlgmr.msra.gmra.mrb[48].mxu0 %vm642_vm0, %v5533_v60  ;;  %4609 = vmatmul.mubr.msk.bf16.vlgmr.msra.gmra.mrb[56].mxu1 %vm642_vm0, %v5533_v60 }
 0xa64   : > { %4597 = vmatpush3.bf16.msra.mxu0 %v4851_v8  ;;  %4621 = vmatpush3.bf16.msra.mxu1 %v4852_v10 }
 0xa65   : > { %4598 = vmatprep.subr.bf16.mxu0 %v4987_v9  ;;  %4622 = vmatprep.subr.bf16.mxu1 %v4987_v9 }
 0xa66   : > { %4600 = vmatprep.mubr.msk.bf16.mxu0 %vm4988_vm1, %v4987_v9  ;;  %4624 = vmatprep.mubr.msk.bf16.mxu1 %vm4988_vm1, %v4987_v9 }
 0xa68   : > { %4599 = vmatpush3.bf16.msra.mxu0 %v4853_v11  ;;  %4623 = vmatpush3.bf16.msra.mxu1 %v4854_v12 }
 0xa69   : > { %4612 = vmatprep.subr.bf16.mxu0 %v4987_v9  ;;  %4636 = vmatprep.subr.bf16.mxu1 %v4987_v9 }
 0xa6b   : > { %4601 = vmatmul.mubr.msk.bf16.vlgmr.msra.gmra.mrb[52].mxu0 %vm642_vm0, %v5533_v60  ;;  %4625 = vmatmul.mubr.msk.bf16.vlgmr.msra.gmra.mrb[60].mxu1 %vm642_vm0, %v5533_v60 }
 0xa6c   : > { %4613 = vmatpush3.bf16.msra.mxu0 %v4855_v13  ;;  %4637 = vmatpush3.bf16.msra.mxu1 %v4856_v20 }
 0xa6d   : > { %4614 = vmatprep.subr.bf16.mxu0 %v4987_v9  ;;  %4638 = vmatprep.subr.bf16.mxu1 %v4987_v9 }
 0xa6e   : > { %4616 = vmatprep.mubr.msk.bf16.mxu0 %vm4988_vm1, %v4987_v9  ;;  %4640 = vmatprep.mubr.msk.bf16.mxu1 %vm4988_vm1, %v4987_v9 }
 0xa70   : > { %4615 = vmatpush3.bf16.msra.mxu0 %v4857_v14  ;;  %4639 = vmatpush3.bf16.msra.mxu1 %v4858_v15 }
 0xa71   : > { %4628 = vmatprep.subr.bf16.mxu0 %v4987_v9  ;;  %4652 = vmatprep.subr.bf16.mxu1 %v4987_v9 }
 0xa73   : > { %4617 = vmatmul.mubr.msk.bf16.vlgmr.msra.gmra.mrb[56].mxu0 %vm642_vm0, %v5533_v60  ;;  %4641 = vmatmul.mubr.msk.bf16.vlgmr.msra.gmra.mrb[64].mxu1 %vm642_vm0, %v5533_v60 }
 0xa74   : > { %4629 = vmatpush3.bf16.msra.mxu0 %v4859_v16  ;;  %4653 = vmatpush3.bf16.msra.mxu1 %v4860_v17 }
 0xa75   : > { %4630 = vmatprep.subr.bf16.mxu0 %v4987_v9  ;;  %4654 = vmatprep.subr.bf16.mxu1 %v4987_v9 }
 0xa76   : > { %4632 = vmatprep.mubr.msk.bf16.mxu0 %vm4988_vm1, %v4987_v9  ;;  %4656 = vmatprep.mubr.msk.bf16.mxu1 %vm4988_vm1, %v4987_v9 }
 0xa78   : > { %4631 = vmatpush3.bf16.msra.mxu0 %v4861_v18  ;;  %4655 = vmatpush3.bf16.msra.mxu1 %v4862_v19  ;;  %v4124_v19 = vld [vmem:[%s5889_s5 + $0x5] ss:$0 sm:$0xff] }
 0xa79   : > { %4644 = vmatprep.subr.bf16.mxu0 %v4987_v9  ;;  %4668 = vmatprep.subr.bf16.mxu1 %v4987_v9 }
 0xa7b   : > { %4633 = vmatmul.mubr.msk.bf16.vlgmr.msra.gmra.mrb[60].mxu0 %vm642_vm0, %v5533_v60  ;;  %4657 = vmatmul.mubr.msk.bf16.vlgmr.msra.gmra.mrb[68].mxu1 %vm642_vm0, %v5533_v60 }
 0xa7c   : > { %4645 = vmatpush3.bf16.msra.mxu0 %v4863_v21  ;;  %4669 = vmatpush3.bf16.msra.mxu1 %v4864_v22 }
 0xa7d   : > { %4646 = vmatprep.subr.bf16.mxu0 %v4987_v9  ;;  %4670 = vmatprep.subr.bf16.mxu1 %v4987_v9 }
 0xa7e   : > { %4648 = vmatprep.mubr.msk.bf16.mxu0 %vm4988_vm1, %v4987_v9  ;;  %4672 = vmatprep.mubr.msk.bf16.mxu1 %vm4988_vm1, %v4987_v9 }
 0xa80   : > { %4647 = vmatpush3.bf16.msra.mxu0 %v4865_v23  ;;  %4671 = vmatpush3.bf16.msra.mxu1 %v4866_v24  ;;  %v4162_v23 = vld [vmem:[%s5891_s7 + $0x7] ss:$0 sm:$0xff] }
 0xa81   : > { %4660 = vmatprep.subr.bf16.mxu0 %v4987_v9  ;;  %4684 = vmatprep.subr.bf16.mxu1 %v4987_v9 }
 0xa83   : > { %4649 = vmatmul.mubr.msk.bf16.vlgmr.msra.gmra.mrb[64].mxu0 %vm642_vm0, %v5533_v60  ;;  %4673 = vmatmul.mubr.msk.bf16.vlgmr.msra.gmra.mrb[72].mxu1 %vm642_vm0, %v5533_v60 }
 0xa84   : > { %4661 = vmatpush3.bf16.msra.mxu0 %v4867_v25  ;;  %4664 = vmatprep.mubr.msk.bf16.mxu0 %vm4988_vm1, %v4987_v9 }
 0xa85   : > { %4662 = vmatprep.subr.bf16.mxu0 %v4987_v9  ;;  %4686 = vmatprep.mubr.msk.bf16.mxu1 %vm4988_vm1, %v4987_v9 }
 0xa88   : > { %4663 = vmatpush3.bf16.msra.mxu0 %v4868_v26 }
 0xa89   : > { %4676 = vmatprep.subr.bf16.mxu0 %v4987_v9 }
 0xa8b   : > { %4665 = vmatmul.mubr.msk.bf16.vlgmr.msra.gmra.mrb[68].mxu0 %vm642_vm0, %v5533_v60 }
 0xa8c   : > { %4677 = vmatpush3.bf16.msra.mxu0 %v4869_v27  ;;  %4680 = vmatprep.mubr.msk.bf16.mxu0 %vm4988_vm1, %v4987_v9 }
 0xa8d   : > { %4678 = vmatprep.subr.bf16.mxu0 %v4987_v9 }
 0xa90   : > { %4679 = vmatpush3.bf16.msra.mxu0 %v4870_v28 }
 0xa91   : > { %4690 = vmatprep.subr.bf16.mxu0 %v4987_v9 }
 0xa93   : > { %4681 = vmatmul.mubr.msk.bf16.vlgmr.msra.gmra.mrb[72].mxu0 %vm642_vm0, %v5533_v60 }
 0xa94   : > { %4692 = vmatprep.mubr.msk.bf16.mxu0 %vm4988_vm1, %v4987_v9 }
 0xb36   : > { %v2399_v29 = vpop.f32.mrb[48].mxu0  ;;  %v2503_v30 = vpop.f32.mrb[56].mxu1 }
 0xb37   : > { %v4594_v31 = vpop.f32.mrb[49].mxu0  ;;  %v4610_v32 = vpop.f32.mrb[57].mxu1  ;;  %v2400_v52 = vadd.f32 %v4123_v49, %v2399_v29  ;;  %v2504_v5 = vadd.f32 %v4125_v1, %v2503_v30 }
 0xb38   : > { %v2402_v33 = vpop.f32.mrb[50].mxu0  ;;  %v2506_v34 = vpop.f32.mrb[58].mxu1 }
 0xb39   : > { %v4595_v35 = vpop.f32.mrb[51].mxu0  ;;  %v4611_v36 = vpop.f32.mrb[59].mxu1  ;;  %v3069_v61 = vpack.c.bf16 %v2400_v52, %v2400_v52  ;;  %v3071_v14 = vpack.c.bf16 %v2504_v5, %v2504_v5 }
 0xb3a   : > { %v4126_v36 = vld [vmem:[%s5889_s5 + $0x7] ss:$0 sm:$0xff] }
 0xb3e   : > { %v2451_v39 = vpop.f32.mrb[52].mxu0  ;;  %v2653_v40 = vpop.f32.mrb[60].mxu1 }
 0xb3f   : > { %v2654_v41 = vadd.f32 %v4159_v37, %v2653_v40  ;;  %v4602_v42 = vpop.f32.mrb[53].mxu0  ;;  %v4626_v43 = vpop.f32.mrb[61].mxu1  ;;  %v2452_v24 = vadd.f32 %v4124_v19, %v2451_v39  ;;  %v4196_v39 = vld [vmem:[%s5893_s9 + $0x5] ss:$0 sm:$0xff] }
 0xb40   : > { %v2454_v44 = vpop.f32.mrb[54].mxu0  ;;  %v2656_v45 = vpop.f32.mrb[62].mxu1 }
 0xb41   : > { %v3073_v46 = vpack.c.bf16 %v2654_v41, %v2654_v41  ;;  %v4603_v47 = vpop.f32.mrb[55].mxu0  ;;  %v4627_v48 = vpop.f32.mrb[63].mxu1  ;;  %v3070_v32 = vpack.c.bf16 %v2452_v24, %v2452_v24 }
 0xb43   : > { %v3081_v50 = vsel %vm1440_vm2, %v3073_v46, 0 }
 0xb44   : > { %4685 = vmatpush3.bf16.xpose.msra.mxu1 %v3081_v50 }
 0xb45   : > { %4696 = vmatprep.subr.bf16.mxu1 %v4987_v9 }
 0xb46   : > { %v2555_v53 = vpop.f32.mrb[56].mxu0  ;;  %v2757_v54 = vpop.f32.mrb[64].mxu1 }
 0xb47   : > { %v2758_v55 = vadd.f32 %v4161_v51, %v2757_v54  ;;  %v4618_v56 = vpop.f32.mrb[57].mxu0  ;;  %v4642_v57 = vpop.f32.mrb[65].mxu1  ;;  %v2556_v40 = vadd.f32 %v4126_v36, %v2555_v53 }
 0xb48   : > { %v2558_v58 = vpop.f32.mrb[58].mxu0  ;;  %v2760_v59 = vpop.f32.mrb[66].mxu1 }
 0xb49   : > { %v3075_v62 = vpack.c.bf16 %v2758_v55, %v2758_v55  ;;  %v4619_v63 = vpop.f32.mrb[59].mxu0  ;;  %v4643_v38 = vpop.f32.mrb[67].mxu1  ;;  %v3072_v45 = vpack.c.bf16 %v2556_v40, %v2556_v40 }
 0xb4b   : > { %v3173_v2 = vsel %vm1440_vm2, %v3075_v62, 0  ;;  %4687 = vmatmul.mubr.msk.bf16.vlgmr.msra.gmra.mrb[76].mxu1 %vm1440_vm2, %v3069_v61 }
 0xb4c   : > { %4697 = vmatpush3.bf16.xpose.msra.mxu1 %v3173_v2  ;;  %4698 = vmatprep.mubr.msk.bf16.mxu1 %vm4988_vm1, %v4987_v9 }
 0xb4d   : > { %4708 = vmatprep.subr.bf16.mxu1 %v4987_v9 }
 0xb4e   : > { %v2705_v6 = vpop.f32.mrb[60].mxu0  ;;  %v2907_v8 = vpop.f32.mrb[68].mxu1 }
 0xb4f   : > { %v2706_v10 = vadd.f32 %v4160_v3, %v2705_v6  ;;  %v2908_v60 = vadd.f32 %v4195_v4, %v2907_v8  ;;  %v4634_v11 = vpop.f32.mrb[61].mxu0  ;;  %v4658_v12 = vpop.f32.mrb[69].mxu1 }
 0xb50   : > { %v2708_v13 = vpop.f32.mrb[62].mxu0  ;;  %v2910_v20 = vpop.f32.mrb[70].mxu1 }
 0xb51   : > { %v3074_v15 = vpack.c.bf16 %v2706_v10, %v2706_v10  ;;  %v3317_v16 = vpack.c.bf16 %v2908_v60, %v2908_v60  ;;  %v4635_v17 = vpop.f32.mrb[63].mxu0  ;;  %v4659_v18 = vpop.f32.mrb[71].mxu1 }
 0xb53   : > { %v3127_v21 = vsel %vm1440_vm2, %v3074_v15, 0  ;;  %v3325_v22 = vsel %vm1694_vm3, %v3317_v16, 0  ;;  %4699 = vmatmul.mubr.msk.bf16.vlgmr.msra.gmra.mrb[80].mxu1 %vm1440_vm2, %v3071_v14 }
 0xb54   : > { %4691 = vmatpush3.bf16.xpose.msra.mxu0 %v3127_v21  ;;  %4709 = vmatpush3.bf16.msra.mxu1 %v3325_v22 }
 0xb55   : > { %4702 = vmatprep.subr.bf16.mxu0 %v4987_v9  ;;  %4710 = vmatprep.mubr.msk.bf16.mxu1 %vm4988_vm1, %v4987_v9 }
 0xb56   : > { %v2809_v25 = vpop.f32.mrb[64].mxu0  ;;  %v5694_v26 = vpop.f32.mrb[72].mxu1  ;;  %4720 = vmatprep.subr.bf16.mxu1 %v4987_v9 }
 0xb57   : > { %v2810_v27 = vadd.f32 %v4162_v23, %v2809_v25  ;;  %v4650_v28 = vpop.f32.mrb[65].mxu0  ;;  %v4674_v29 = vpop.f32.mrb[73].mxu1 }
 0xb58   : > { %v2812_v30 = vpop.f32.mrb[66].mxu0  ;;  %v3014_v31 = vpop.f32.mrb[74].mxu1 }
 0xb59   : > { %v3076_v33 = vpack.c.bf16 %v2810_v27, %v2810_v27  ;;  %v4651_v34 = vpop.f32.mrb[67].mxu0  ;;  %v4675_v35 = vpop.f32.mrb[75].mxu1 }
 0xb5b   : > { %v3219_v37 = vsel %vm1440_vm2, %v3076_v33, 0  ;;  %4693 = vmatmul.mubr.msk.bf16.vlgmr.msra.gmra.mrb[76].mxu0 %vm1440_vm2, %v3070_v32 }
 0xb5c   : > { %4703 = vmatpush3.bf16.xpose.msra.mxu0 %v3219_v37  ;;  %4704 = vmatprep.mubr.msk.bf16.mxu0 %vm4988_vm1, %v4987_v9 }
 0xb5d   : > { %4714 = vmatprep.subr.bf16.mxu0 %v4987_v9 }
 0xb5e   : > { %v2959_v41 = vpop.f32.mrb[68].mxu0 }
 0xb5f   : > { %v2960_v42 = vadd.f32 %v4196_v39, %v2959_v41  ;;  %v4666_v43 = vpop.f32.mrb[69].mxu0  ;;  %v4197_v41 = vld [vmem:[%s5893_s9 + $0x6] ss:$0 sm:$0xff] }
 0xb60   : > { %v2962_v44 = vpop.f32.mrb[70].mxu0 }
 0xb61   : > { %v3318_v46 = vpack.c.bf16 %v2960_v42, %v2960_v42  ;;  %v4667_v47 = vpop.f32.mrb[71].mxu0  ;;  %v3012_v42 = vadd.f32 %v4197_v41, %v5694_v26 }
 0xb63   : > { %v3371_v48 = vsel %vm1694_vm3, %v3318_v46, 0  ;;  %4705 = vmatmul.mubr.msk.bf16.vlgmr.msra.gmra.mrb[80].mxu0 %vm1440_vm2, %v3072_v45  ;;  %v3319_v45 = vpack.c.bf16 %v3012_v42, %v3012_v42 }
 0xb64   : > { %4715 = vmatpush3.bf16.msra.mxu0 %v3371_v48  ;;  %4716 = vmatprep.mubr.msk.bf16.mxu0 %vm4988_vm1, %v4987_v9 }
 0xb65   : > { %4726 = vmatprep.subr.bf16.mxu0 %v4987_v9  ;;  %v3417_v48 = vsel %vm1694_vm3, %v3319_v45, 0 }
 0xb66   : > { %v5713_v49 = vpop.f32.mrb[72].mxu0 }
 0xb67   : > { %v4682_v50 = vpop.f32.mrb[73].mxu0 }
 0xb68   : > { %v3066_v51 = vpop.f32.mrb[74].mxu0 }
 0xb69   : > { %v4683_v52 = vpop.f32.mrb[75].mxu0 }
 0xb6a   : > { %v4198_v52 = vld [vmem:[%s5893_s9 + $0x7] ss:$0 sm:$0xff] }
 0xc1e   : > { %v3117_v53 = vpop.f32.mrb[76].mxu1 }
 0xc1f   : > { %v3261_v54 = vmul.f32 0.35355338, %v3117_v53  ;;  %v4688_v55 = vpop.f32.mrb[77].mxu1 }
 0xc20   : > { %v3120_v56 = vpop.f32.mrb[78].mxu1 }
 0xc21   : > { %v4689_v57 = vpop.f32.mrb[79].mxu1  ;;  %v3265_v58 = vadd.f32 %v5377_v0, %v3261_v54  ;;  %v3064_v54 = vadd.f32 %v4198_v52, %v5713_v49 }
 0xc23   : > { %v3269_v59 = vsel %vm1440_vm2, %v3265_v58, -inf  ;;  %v3320_v57 = vpack.c.bf16 %v3064_v54, %v3064_v54 }
 0xc24   : > { %3270 = vmax.xlane.f32.xlu0 %v3269_v59 }
 0xc26   : > { %v3209_v61 = vpop.f32.mrb[80].mxu1 }
 0xc27   : > { %v3263_v62 = vmul.f32 0.35355338, %v3209_v61  ;;  %v4700_v63 = vpop.f32.mrb[81].mxu1  ;;  %v3463_v61 = vsel %vm1694_vm3, %v3320_v57, 0 }
 0xc28   : > { %v3212_v38 = vpop.f32.mrb[82].mxu1 }
 0xc29   : > { %v4701_v1 = vpop.f32.mrb[83].mxu1  ;;  %v3267_v2 = vadd.f32 %v5377_v0, %v3263_v62  ;;  %v4219_v38 = vld [vmem:[%s5894_s10 + $0x10] sm:$0xf] }
 0xc2a   : > { %v3518_v1 = vsel %vm1694_vm3, %v4219_v38, 0 }
 0xc2b   : > { %v3275_v3 = vsel %vm1440_vm2, %v3267_v2, -inf }
 0xc2c   : > { %3276 = vmax.xlane.f32.xlu0 %v3275_v3 }
 0xc2e   : > { %v3163_v4 = vpop.f32.mrb[76].mxu0 }
 0xc2f   : > { %v3262_v5 = vmul.f32 0.35355338, %v3163_v4  ;;  %v4694_v6 = vpop.f32.mrb[77].mxu0  ;;  %v4221_v4 = vld [vmem:[%s5894_s10 + $0x18] sm:$0xf] }
 0xc30   : > { %v3166_v8 = vpop.f32.mrb[78].mxu0 }
 0xc31   : > { %v4695_v10 = vpop.f32.mrb[79].mxu0  ;;  %v3266_v60 = vadd.f32 %v5377_v0, %v3262_v5 }
 0xc32   : > { %v3610_v10 = vsel %vm1694_vm3, %v4221_v4, 0 }
 0xc33   : > { %v3272_v11 = vsel %vm1440_vm2, %v3266_v60, -inf }
 0xc34   : > { %3273 = vmax.xlane.f32.xlu1 %v3272_v11 }
 0xc36   : > { %v3255_v12 = vpop.f32.mrb[80].mxu0 }
 0xc37   : > { %v3264_v13 = vmul.f32 0.35355338, %v3255_v12  ;;  %v4706_v20 = vpop.f32.mrb[81].mxu0 }
 0xc38   : > { %v3258_v14 = vpop.f32.mrb[82].mxu0 }
 0xc39   : > { %v4707_v15 = vpop.f32.mrb[83].mxu0  ;;  %v3268_v16 = vadd.f32 %v5377_v0, %v3264_v13 }
 0xc3b   : > { %v3278_v17 = vsel %vm1440_vm2, %v3268_v16, -inf }
 0xc3c   : > { %3279 = vmax.xlane.f32.xlu1 %v3278_v17 }
 0xcb1   : > { %v3271_v18 = vpop.xlane.xlu0 %3270 }
 0xcb2   : > { %v3281_v19 = vsub.f32 %v3265_v58, %v3271_v18 }
 0xcb4   : > { %v3285_v21 = vmul.f32 1.442695, %v3281_v19 }
 0xcb6   : > { %4901 = vpow2.f32 %v3285_v21 }
 0xcb9   : > { %v3277_v22 = vpop.xlane.xlu0 %3276 }
 0xcba   : > { %v3283_v23 = vsub.f32 %v3267_v2, %v3277_v22  ;;  %v4220_v2 = vld [vmem:[%s5894_s10 + $0x14] sm:$0xf] }
 0xcbb   : > { %v3564_v3 = vsel %vm1694_vm3, %v4220_v2, 0 }
 0xcbc   : > { %v3289_v24 = vmul.f32 1.442695, %v3283_v23 }
 0xcbe   : > { %4903 = vpow2.f32 %v3289_v24 }
 0xcc0   : > { %v4902_v25 = vpop.eup %4901 }
 0xcc1   : > { %v3274_v27 = vpop.xlane.xlu1 %3273  ;;  %v3293_v28 = vsel %vm1440_vm2, %v4902_v25, 0.0 }
 0xcc2   : > { %v3282_v29 = vsub.f32 %v3266_v60, %v3274_v27  ;;  %3294 = vadd.xlane.f32.xlu0 %v3293_v28 }
 0xcc4   : > { %v3287_v30 = vmul.f32 1.442695, %v3282_v29 }
 0xcc6   : > { %4905 = vpow2.f32 %v3287_v30 }
 0xcc8   : > { %v4904_v0 = vpop.eup %4903 }
 0xcc9   : > { %v3280_v31 = vpop.xlane.xlu1 %3279  ;;  %v3299_v32 = vsel %vm1440_vm2, %v4904_v0, 0.0 }
 0xcca   : > { %v3284_v33 = vsub.f32 %v3268_v16, %v3280_v31  ;;  %3300 = vadd.xlane.f32.xlu0 %v3299_v32  ;;  %v4222_v16 = vld [vmem:[%s5894_s10 + $0x1c] sm:$0xf] }
 0xccb   : > { %v3656_v21 = vsel %vm1694_vm3, %v4222_v16, 0 }
 0xccc   : > { %v3291_v34 = vmul.f32 1.442695, %v3284_v33 }
 0xcce   : > { %4907 = vpow2.f32 %v3291_v34 }
 0xcd0   : > { %v4906_v35 = vpop.eup %4905 }
 0xcd1   : > { %v3296_v36 = vsel %vm1440_vm2, %v4906_v35, 0.0 }
 0xcd2   : > { %3297 = vadd.xlane.f32.xlu1 %v3296_v36 }
 0xcd8   : > { %v4908_v37 = vpop.eup %4907 }
 0xcd9   : > { %v3302_v39 = vsel %vm1440_vm2, %v4908_v37, 0.0 }
 0xcda   : > { %3303 = vadd.xlane.f32.xlu1 %v3302_v39 }
 0xd4f   : > { %v3295_v40 = vpop.xlane.xlu0 %3294 }
 0xd50   : > { %4909 = vrcp.f32 %v3295_v40 }
 0xd57   : > { %v3301_v43 = vpop.xlane.xlu0 %3300 }
 0xd58   : > { %4911 = vrcp.f32 %v3301_v43 }
 0xd5a   : > { %v4910_v44 = vpop.eup %4909 }
 0xd5b   : > { %v3309_v46 = vmul.f32 %v4910_v44, %v4902_v25 }
 0xd5d   : > { %v3313_v47 = vpack.c.bf16 %v3309_v46, %v3309_v46 }
 0xd5f   : > { %v3298_v50 = vpop.xlane.xlu1 %3297  ;;  %4711 = vmatmul.mubr.msk.bf16.vlgmr.msra.gmra.mrb[84].mxu1 %vm1440_vm2, %v3313_v47 }
 0xd60   : > { %4913 = vrcp.f32 %v3298_v50  ;;  %4721 = vmatpush3.bf16.msra.mxu1 %v3417_v48  ;;  %4722 = vmatprep.mubr.msk.bf16.mxu1 %vm4988_vm1, %v4987_v9  ;;  %v4228_v50 = vld [vmem:[%s5895_s11 + $0x1] ss:$0 sm:$0xff] }
 0xd61   : > { %4732 = vmatprep.subr.bf16.mxu1 %v4987_v9 }
 0xd62   : > { %v4912_v51 = vpop.eup %4911 }
 0xd63   : > { %v3311_v26 = vmul.f32 %v4912_v51, %v4904_v0 }
 0xd65   : > { %v3315_v53 = vpack.c.bf16 %v3311_v26, %v3311_v26 }
 0xd67   : > { %v3304_v55 = vpop.xlane.xlu1 %3303  ;;  %4723 = vmatmul.mubr.msk.bf16.vlgmr.msra.gmra.mrb[88].mxu1 %vm1440_vm2, %v3315_v53 }
 0xd68   : > { %4915 = vrcp.f32 %v3304_v55  ;;  %4734 = vmatprep.mubr.msk.bf16.mxu1 %vm4988_vm1, %v4987_v9  ;;  %4733 = vmatpush3.bf16.msra.mxu1 %v3518_v1 }
 0xd69   : > { %4744 = vmatprep.subr.bf16.mxu1 %v4987_v9 }
 0xd6a   : > { %v4914_v56 = vpop.eup %4913 }
 0xd6b   : > { %v3310_v58 = vmul.f32 %v4914_v56, %v4906_v35 }
 0xd6d   : > { %v3314_v59 = vpack.c.bf16 %v3310_v58, %v3310_v58 }
 0xd6f   : > { %4717 = vmatmul.mubr.msk.bf16.vlgmr.msra.gmra.mrb[84].mxu0 %vm1440_vm2, %v3314_v59 }
 0xd70   : > { %4727 = vmatpush3.bf16.msra.mxu0 %v3463_v61  ;;  %4728 = vmatprep.mubr.msk.bf16.mxu0 %vm4988_vm1, %v4987_v9 }
 0xd71   : > { %4738 = vmatprep.subr.bf16.mxu0 %v4987_v9 }
 0xd72   : > { %v4916_v49 = vpop.eup %4915 }
 0xd73   : > { %v3312_v62 = vmul.f32 %v4916_v49, %v4908_v37 }
 0xd75   : > { %v3316_v63 = vpack.c.bf16 %v3312_v62, %v3312_v62  ;;  %v4871_v62 = vld [vmem:[%s5898_s14 + $0x10] sm:$0xff]  }
 0xd77   : > { %4729 = vmatmul.mubr.msk.bf16.vlgmr.msra.gmra.mrb[88].mxu0 %vm1440_vm2, %v3316_v63  ;;  %v4872_v63 = vld [vmem:[%s5898_s14 + $0x18] sm:$0xff]  }
 0xd78   : > { %4740 = vmatprep.mubr.msk.bf16.mxu0 %vm4988_vm1, %v4987_v9  ;;  %4739 = vmatpush3.bf16.msra.mxu0 %v3564_v3  ;;  %v4231_v3 = vld [vmem:[%s5896_s12 + $0x1] ss:$0 sm:$0xff] }
 0xd79   : > { %4750 = vmatprep.subr.bf16.mxu0 %v4987_v9 }
 0xe32   : > { %v3361_v5 = vpop.f32.mrb[84].mxu1 }
 0xe33   : > { %v3505_v6 = vpack.c.bf16 %v3361_v5, %v3361_v5  ;;  %v4712_v8 = vpop.f32.mrb[85].mxu1  ;;  %v4232_v5 = vld [vmem:[%s5897_s13 + $0x1] ss:$0 sm:$0xff] }
 0xe34   : > { %v3364_v60 = vpop.f32.mrb[86].mxu1 }
 0xe35   : > { %v4713_v11 = vpop.f32.mrb[87].mxu1  ;;  %4735 = vmatmul.mubr.msk.bf16.vlgmr.msra.gmra.mrb[92].mxu1 %vm1440_vm2, %v3505_v6  ;;  %v4873_v60 = vld [vmem:[%s5900_s16 + $0x20] sm:$0xff]  }
 0xe36   : > { %4745 = vmatpush3.bf16.msra.mxu1 %v3610_v10  ;;  %4746 = vmatprep.mubr.msk.bf16.mxu1 %vm4988_vm1, %v4987_v9  ;;  %v4874_v11 = vld [vmem:[%s5900_s16 + $0x28] sm:$0xff]  }
 0xe37   : > { %4756 = vmatprep.subr.bf16.mxu1 %v4987_v9 }
 0xe3a   : > { %v3453_v12 = vpop.f32.mrb[88].mxu1 }
 0xe3b   : > { %v3507_v13 = vpack.c.bf16 %v3453_v12, %v3453_v12  ;;  %v4724_v20 = vpop.f32.mrb[89].mxu1  ;;  %v4875_v12 = vld [vmem:[%s5900_s16 + $0x30] sm:$0xff]  }
 0xe3c   : > { %v3456_v14 = vpop.f32.mrb[90].mxu1  ;;  %v4238_v20 = vld [vmem:[%s5899_s15 + $0x1] ss:$0 sm:$0xff] }
 0xe3d   : > { %v4725_v15 = vpop.f32.mrb[91].mxu1  ;;  %4747 = vmatmul.mubr.msk.bf16.vlgmr.msra.gmra.mrb[96].mxu1 %vm1440_vm2, %v3507_v13  ;;  %v4876_v13 = vld [vmem:[%s5900_s16 + $0x38] sm:$0xff]  }
 0xe3e   : > { %4760 = vmatprep.mubr.msk.bf16.mxu1 %vm4988_vm1, %v4987_v9  ;;  %4757 = vmatpush3.bf16.msra.mxu1 %v4871_v62 }
 0xe3f   : > { %4758 = vmatprep.subr.bf16.mxu1 %v4987_v9 }
 0xe42   : > { %v3407_v17 = vpop.f32.mrb[84].mxu0  ;;  %4759 = vmatpush3.bf16.msra.mxu1 %v4872_v63 }
 0xe43   : > { %v3506_v18 = vpack.c.bf16 %v3407_v17, %v3407_v17  ;;  %v4718_v19 = vpop.f32.mrb[85].mxu0 }
 0xe44   : > { %v3410_v22 = vpop.f32.mrb[86].mxu0 }
 0xe45   : > { %v4719_v23 = vpop.f32.mrb[87].mxu0  ;;  %4741 = vmatmul.mubr.msk.bf16.vlgmr.msra.gmra.mrb[92].mxu0 %vm1440_vm2, %v3506_v18 }
 0xe46   : > { %4751 = vmatpush3.bf16.msra.mxu0 %v3656_v21  ;;  %4752 = vmatprep.mubr.msk.bf16.mxu0 %vm4988_vm1, %v4987_v9 }
 0xe47   : > { %4764 = vmatprep.subr.bf16.mxu0 %v4987_v9 }
 0xe4a   : > { %v3499_v24 = vpop.f32.mrb[88].mxu0 }
 0xe4b   : > { %v3508_v25 = vpack.c.bf16 %v3499_v24, %v3499_v24  ;;  %v4730_v27 = vpop.f32.mrb[89].mxu0 }
 0xe4c   : > { %v3502_v28 = vpop.f32.mrb[90].mxu0 }
 0xe4d   : > { %v4731_v29 = vpop.f32.mrb[91].mxu0  ;;  %4753 = vmatmul.mubr.msk.bf16.vlgmr.msra.gmra.mrb[96].mxu0 %vm1440_vm2, %v3508_v25 }
 0xe4e   : > { %4772 = vmatprep.mubr.msk.bf16.mxu0 %vm4988_vm1, %v4987_v9  ;;  %4765 = vmatpush3.bf16.msra.mxu0 %v4873_v60 }
 0xe4f   : > { %4766 = vmatprep.subr.bf16.mxu0 %v4987_v9 }
 0xe52   : > { %4767 = vmatpush3.bf16.msra.mxu0 %v4874_v11 }
 0xe53   : > { %4768 = vmatprep.subr.bf16.mxu0 %v4987_v9 }
 0xe56   : > { %4769 = vmatpush3.bf16.msra.mxu0 %v4875_v12 }
 0xe57   : > { %4770 = vmatprep.subr.bf16.mxu0 %v4987_v9 }
 0xe5a   : > { %4771 = vmatpush3.bf16.msra.mxu0 %v4876_v13 }
 0xf08   : > { %v3554_v30 = vpop.f32.mrb[92].mxu1 }
 0xf09   : > { %v4736_v0 = vpop.f32.mrb[93].mxu1  ;;  %v3698_v39 = vsel %vm642_vm0, %v3554_v30, 0.0  ;;  %v4251_v30 = vld [vmem:[%s5901_s17 + $0x1] ss:$0 sm:$0xff] }
 0xf0a   : > { %v3557_v31 = vpop.f32.mrb[94].mxu1 }
 0xf0b   : > { %v4737_v32 = vpop.f32.mrb[95].mxu1 }
 0xf10   : > { %v3646_v33 = vpop.f32.mrb[96].mxu1 }
 0xf11   : > { %v4748_v34 = vpop.f32.mrb[97].mxu1  ;;  %v3701_v44 = vsel %vm642_vm0, %v3646_v33, 0.0 }
 0xf12   : > { %v3649_v35 = vpop.f32.mrb[98].mxu1 }
 0xf13   : > { %v4749_v36 = vpop.f32.mrb[99].mxu1 }
 0xf18   : > { %v3600_v37 = vpop.f32.mrb[92].mxu0 }
 0xf19   : > { %v3699_v40 = vsel %vm642_vm0, %v3600_v37, 0.0  ;;  %v4742_v41 = vpop.f32.mrb[93].mxu0 }
 0xf1a   : > { %v3700_v42 = vadd.f32 %v3699_v40, %v3698_v39  ;;  %v3603_v43 = vpop.f32.mrb[94].mxu0 }
 0xf1b   : > { %v4743_v45 = vpop.f32.mrb[95].mxu0 }
 0xf1c   : > { %v3702_v46 = vadd.f32 %v3701_v44, %v3700_v42 }
 0xf20   : > { %v3692_v47 = vpop.f32.mrb[96].mxu0 }
 0xf21   : > { %v3703_v48 = vsel %vm642_vm0, %v3692_v47, 0.0  ;;  %v4754_v51 = vpop.f32.mrb[97].mxu0  ;;  %v4259_v47 = vld [vmem:[%s5902_s18 + $0x1] ss:$0 sm:$0xff] }
 0xf22   : > { %v3704_v26 = vadd.f32 %v3703_v48, %v3702_v46  ;;  %v3695_v52 = vpop.f32.mrb[98].mxu0 }
 0xf23   : > { %v4755_v53 = vpop.f32.mrb[99].mxu0 }
 0xf24   : > { %v3713_v54 = vadd.f32 %v4228_v50, %v3704_v26  ;;  %v4260_v50 = vld [vmem:[%s5903_s19 + $0x1] ss:$0 sm:$0xff] }
 0xf26   : > { %v3714_v55 = vadd.f32 %v3713_v54, %v5523_v7 }
 0xf28   : > { %v3719_v56 = vsel %vm642_vm0, %v3714_v55, 0.0 }
 0xf29   : > { %3720 = vadd.xlane.f32.xlu0 %v3719_v56 }
 0xfb6   : > { %v3721_v57 = vpop.xlane.xlu0 %3720 }
 0xfb7   : > { %v3722_v58 = vmul.f32 0.03125, %v3721_v57 }
 0xfb9   : > { %v3723_v59 = vsub.f32 %v3714_v55, %v3722_v58 }
 0xfbb   : > { %v3724_v61 = vmul.f32 %v3723_v59, %v3723_v59 }
 0xfbd   : > { %v3725_v49 = vsel %vm642_vm0, %v3724_v61, 0.0 }
 0xfbe   : > { %3726 = vadd.xlane.f32.xlu1 %v3725_v49 }
0x104b   : > { %v3727_v7 = vpop.xlane.xlu1 %3726 }
0x104c   : > { %v3728_v38 = vmul.f32 0.03125, %v3727_v7 }
0x104e   : > { %v3729_v1 = vadd.f32 1e-12, %v3728_v38 }
0x1050   : > { %4917 = vrsqrt.f32 %v3729_v1 }
0x105a   : > { %v4918_v2 = vpop.eup %4917 }
0x105b   : > { %v3731_v4 = vmul.f32 %v4918_v2, %v3723_v59 }
0x105d   : > { %v3738_v6 = vmul.f32 %v4231_v3, %v3731_v4 }
0x105f   : > { %v3745_v8 = vadd.f32 %v4232_v5, %v3738_v6 }
0x1061   : > { %v3746_v10 = vpack.c.bf16 %v3745_v8, %v3745_v8 }
0x1063   : > { %4761 = vmatmul.mubr.msk.bf16.vlgmr.msra.gmra.mrb[100].mxu1 %vm642_vm0, %v3746_v10 }
0x1136   : > { %v3809_v14 = vpop.f32.mrb[100].mxu1 }
0x1137   : > { %v3810_v15 = vadd.f32 %v4238_v20, %v3809_v14  ;;  %v4762_v16 = vpop.f32.mrb[101].mxu1 }
0x1138   : > { %v3812_v17 = vpop.f32.mrb[102].mxu1 }
0x1139   : > { %v3816_v18 = vmul.f32 0.044715, %v3810_v15  ;;  %v4763_v19 = vpop.f32.mrb[103].mxu1  ;;  %v3815_v27 = vmul.f32 0.5, %v3810_v15 }
0x113b   : > { %v3817_v21 = vmul.f32 %v3816_v18, %v3810_v15 }
0x113d   : > { %v3818_v22 = vmul.f32 %v3817_v21, %v3810_v15 }
0x113f   : > { %v3819_v23 = vadd.f32 %v3818_v22, %v3810_v15 }
0x1141   : > { %v3820_v24 = vmul.f32 0.7978846, %v3819_v23 }
0x1143   : > { %4919 = vtanh.f32 %v3820_v24 }
0x114d   : > { %v4920_v25 = vpop.eup %4919 }
0x114e   : > { %v3822_v28 = vadd.f32 1.0, %v4920_v25 }
0x1150   : > { %v3823_v9 = vmul.f32 %v3822_v28, %v3815_v27 }
0x1152   : > { %v3824_v29 = vpack.c.bf16 %v3823_v9, %v3823_v9 }
0x1154   : > { %4773 = vmatmul.mubr.msk.bf16.vlgmr.msra.gmra.mrb[100].mxu0 %vm2229_vm4, %v3824_v29 }
0x1227   : > { %v3903_v0 = vpop.f32.mrb[100].mxu0 }
0x1228   : > { %v3904_v31 = vadd.f32 %v4251_v30, %v3903_v0  ;;  %v4774_v32 = vpop.f32.mrb[101].mxu0 }
0x1229   : > { %v3906_v33 = vpop.f32.mrb[102].mxu0 }
0x122a   : > { %v4775_v34 = vpop.f32.mrb[103].mxu0  ;;  %v3909_v35 = vadd.f32 %v3904_v31, %v3745_v8 }
0x122c   : > { %v3914_v36 = vsel %vm642_vm0, %v3909_v35, 0.0 }
0x122d   : > { %3915 = vadd.xlane.f32.xlu0 %v3914_v36 }
0x12ba   : > { %v3916_v37 = vpop.xlane.xlu0 %3915 }
0x12bb   : > { %v3917_v39 = vmul.f32 0.03125, %v3916_v37 }
0x12bd   : > { %v3918_v40 = vsub.f32 %v3909_v35, %v3917_v39 }
0x12bf   : > { %v3919_v41 = vmul.f32 %v3918_v40, %v3918_v40 }
0x12c1   : > { %v3920_v42 = vsel %vm642_vm0, %v3919_v41, 0.0 }
0x12c2   : > { %3921 = vadd.xlane.f32.xlu1 %v3920_v42 }
0x134f   : > { %v3922_v43 = vpop.xlane.xlu1 %3921 }
0x1350   : > { %v3923_v44 = vmul.f32 0.03125, %v3922_v43 }
0x1352   : > { %v3924_v45 = vadd.f32 1e-12, %v3923_v44 }
0x1354   : > { %4921 = vrsqrt.f32 %v3924_v45 }
0x135e   : > { %v4922_v46 = vpop.eup %4921 }
0x135f   : > { %v3926_v48 = vmul.f32 %v4922_v46, %v3918_v40 }
0x1361   : > { %v3933_v51 = vmul.f32 %v4259_v47, %v3926_v48 }
0x1363   : > { %v3940_v26 = vadd.f32 %v4260_v50, %v3933_v51 }
0x1365   : > { %3942 = vst.msk [vmem:[%s630_s25] sm:$0x1] %vm3941_vm5, %v3940_v26 }
0x1366   : > { %4936 = shalt.err (!%p4933_p3)
}
0x1367   : > { %s4937_s21 = scalar_lea.hbm %s5842_s0, 16  ;;  %s4941_s24 = scalar_lea.hbm %s5904_s20, 32 }
0x1368   : > { %p4938_p4 = scmp.ne.s32.totalorder %s5842_s0, %s4937_s21  ;;  %p4942_p9 = scmp.lt.u32.totalorder %s5842_s0, %s5904_s20 }
0x1369   : > { %p4943_p10 = scmp.lt.u32.totalorder %s4941_s24, %s4937_s21  ;;  %p4945_p12 = scmp.lt.u32.totalorder %s4937_s21, %s5842_s0 }
0x136a   : > { %p4939_p7 = pnand %p4938_p4, %p5133_p5 }
0x136b   : > { %p4944_p11 = por %p4943_p10, %p4942_p9 }
0x136c   : > { %p4940_p8 = pneg %p4939_p7 }
0x136d   : > { %p4946_p13 = por %p4945_p12, %p4944_p11 }
0x136f   : > { %p4947_p0 = pnand %p4946_p13, %p4940_p8 }
0x1371   : > { %4950 = shalt.err (!%p4947_p0)
}
0x1372   : > { %4776 = dma.vmem_to_hbm [thread:$0]  (%p5133_p5), %s5844_s26, 16, %s5842_s0, %s3944_s23  }
0x1373 PF: > { %s5930_s28 = sld [smem:[#allocation7_spill]]  ;;  %s5931_s30 = sld [smem:[#allocation5_spill]] }
0x1379   : > { %p4782_p1 = scmp.ge.s32.totalorder %s5930_s28, 2  ;;  %s3968_s29 = sand.u32 1, %s5931_s30  }
0x137a   : > { %s3969_s25 = scalar_lea.sflag [#allocation3], %s3968_s29 }
0x137b   : > { %p4779_p2 = pnand %p4782_p1, %p5137_p6 }
0x137d   : > { %4968 = dma.done.wait (!%p4779_p2), %s3969_s25, 16  }
0x137e   : > { %4970 = vsyncadd (!%p4779_p2), %s3969_s25, 4294967280  ;;  %s5933_s24 = sld [smem:[#allocation8_spill]]  ;;  %s5934_s21 = sld [smem:[#allocation6_spill]] }
0x137f   : > { %s5935_s23 = sld [smem:[#allocation9_spill]]  ;;  %s5936_s1 = smov %s4977_s22 }
0x1384   : > { %p30_p3 = scmp.ge.s32.totalorder %s5933_s24, 4   ;;  %s5937_s22 = smov %s5934_s21 }
0x1386   :  { %32 = sbr.rel (!%p30_p3) target bundleno = 9 (0x9), region = 154 }
0x138d   :  { %3973 = vsyncpa [#allocation3], 1 }
0x138e   :  { %3975 = vsyncpa [#allocation3 + $0x1], 1 }

</bundles_post_ra>
